<compile_context>
chip_gen: v7x
topology: tpu7x:2x2x1
jax: 0.10.0
libtpu: 0.0.40
codegen_flags: <defaults>
</compile_context>

<pallas_src>
import math

import numpy as np
import jax
import jax.numpy as jnp
from jax.experimental import pallas as pl
from jax.experimental.pallas import tpu as pltpu


_BN_EPS = 1e-5


# --------------------------------------------------------------------------
# Static (trace-time) matrices for adaptive average pooling and bilinear
# upsampling -- both are fixed linear maps over the spatial grid.
# --------------------------------------------------------------------------
def _adaptive_pool_matrix(in_size, out_size):
    """Row-stochastic (out_size, in_size) matrix matching nn.AdaptiveAvgPool."""
    P = np.zeros((out_size, in_size), np.float32)
    for o in range(out_size):
        s = (o * in_size) // out_size
        e = -((-(o + 1) * in_size) // out_size)  # ceil((o+1)*in/out)
        P[o, s:e] = 1.0 / float(e - s)
    return P


def _bilinear_upsample_matrix(in_size, scale):
    """(out_size, in_size) matrix matching nn.Upsample(bilinear, align_corners=False)."""
    out_size = int(math.floor(in_size * scale))
    ratio = 1.0 / scale
    U = np.zeros((out_size, in_size), np.float32)
    for o in range(out_size):
        src = ratio * (o + 0.5) - 0.5
        if src < 0.0:
            src = 0.0
        i0 = int(math.floor(src))
        i0 = min(i0, in_size - 1)
        i1 = min(i0 + 1, in_size - 1)
        frac = src - float(i0)
        U[o, i0] += 1.0 - frac
        U[o, i1] += frac
    return U


# --------------------------------------------------------------------------
# Pallas kernel: per-image fused  SiLU((X @ W') + shift)  followed by the
# bilinear-upsample matmul  U @ (.)  -- all on-chip, bf16 MXU / f32 accum.
# --------------------------------------------------------------------------
def _dpup_kernel(x_ref, w_ref, b_ref, u_ref, o_ref):
    # x_ref: (1, P_in, C1)  bf16   pooled pixels x in-channels (channels-last)
    # w_ref: (C1, Cout)     bf16   conv weight with BN scale folded in
    # b_ref: (1, Cout)      f32    BN shift
    # u_ref: (P_out, P_in)  bf16   bilinear upsample (Kronecker) matrix
    # o_ref: (1, P_out, Cout) f32
    y = jnp.dot(x_ref[0], w_ref[...], preferred_element_type=jnp.float32)
    y = y + b_ref[...]                     # BN shift (scale already in W')
    y = y * jax.nn.sigmoid(y)              # SiLU in f32
    out = jnp.dot(u_ref[...], y.astype(jnp.bfloat16),
                  preferred_element_type=jnp.float32)
    o_ref[0] = out.astype(o_ref.dtype)


# --------------------------------------------------------------------------
# Wrapper: NCHW in / NCHW out, matching the PyTorch module.
# --------------------------------------------------------------------------
def dpup_forward(x_nchw, params, kernal=(16, 16), scale=1.25):
    N, C1, H, W = x_nchw.shape
    Kp = int(kernal[0])                 # AdaptiveAvgPool2d(kernal[0]) -> (Kp, Kp)
    Cout = params["w"].shape[0]

    # ---- adaptive average pool (exact PyTorch semantics), channels-last out
    Ph = jnp.asarray(_adaptive_pool_matrix(H, Kp))
    Pw = jnp.asarray(_adaptive_pool_matrix(W, Kp))
    pooled = jnp.einsum("ph,nchw,qw->npqc", Ph, x_nchw.astype(jnp.float32), Pw)
    P_in = Kp * Kp
    xm = pooled.reshape(N, P_in, C1).astype(jnp.bfloat16)     # (N, 256, C1)

    # ---- fold BN (eval mode) into the 1x1 conv weight; keep shift in f32
    s = params["gamma"] / jnp.sqrt(params["var"] + _BN_EPS)
    wm = (params["w"].reshape(Cout, C1).T * s[None, :]).astype(jnp.bfloat16)
    shift = (params["beta"] - params["mean"] * s).astype(jnp.float32)
    shift = shift.reshape(1, Cout)

    # ---- bilinear upsample as a single (P_out, P_in) matrix (Kronecker)
    Uy = _bilinear_upsample_matrix(Kp, scale)
    Ux = _bilinear_upsample_matrix(Kp, scale)
    Oh, Ow = Uy.shape[0], Ux.shape[0]
    U = jnp.asarray(np.kron(Uy, Ux)).astype(jnp.bfloat16)     # (400, 256)
    P_out = Oh * Ow

    out = pl.pallas_call(
        _dpup_kernel,
        out_shape=jax.ShapeDtypeStruct((N, P_out, Cout), jnp.float32),
        grid_spec=pltpu.PrefetchScalarGridSpec(
            num_scalar_prefetch=0,
            grid=(N,),
            in_specs=[
                pl.BlockSpec((1, P_in, C1), lambda n: (n, 0, 0)),
                pl.BlockSpec((C1, Cout), lambda n: (0, 0)),
                pl.BlockSpec((1, Cout), lambda n: (0, 0)),
                pl.BlockSpec((P_out, P_in), lambda n: (0, 0)),
            ],
            out_specs=pl.BlockSpec((1, P_out, Cout), lambda n: (n, 0, 0)),
        ),
        compiler_params=pltpu.CompilerParams(
            dimension_semantics=("parallel",)),
    )(xm, wm, shift, U)

    # (N, P_out, Cout) -> (N, Cout, Oh, Ow)   (single boundary transpose)
    return out.reshape(N, Oh, Ow, Cout).transpose(0, 3, 1, 2)


# --------------------------------------------------------------------------
# Deterministic parameter init (shapes from the PyTorch __init__)
# --------------------------------------------------------------------------
def init_dpup_params(key, c1, cout=256):
    k = jax.random.split(key, 5)
    return dict(
        w=0.1 * jax.random.normal(k[0], (cout, c1, 1, 1), jnp.float32),
        gamma=1.0 + 0.1 * jax.random.normal(k[1], (cout,), jnp.float32),
        beta=0.1 * jax.random.normal(k[2], (cout,), jnp.float32),
        mean=0.1 * jax.random.normal(k[3], (cout,), jnp.float32),
        var=1.0 + 0.1 * jnp.abs(jax.random.normal(k[4], (cout,), jnp.float32)),
    )


# --------------------------------------------------------------------------
if __name__ == "__main__":
    key = jax.random.PRNGKey(0)
    k_param, k_input = jax.random.split(key)

    N, C1, H, W = 2, 8, 32, 32
    params = init_dpup_params(k_param, C1, cout=256)
    x = jax.random.normal(k_input, (N, C1, H, W), jnp.float32)

    fwd = jax.jit(dpup_forward)
    out = fwd(x, params)
    out = jax.block_until_ready(out)

    # AdaptiveAvgPool2d(16) -> Conv(c1,256,1)+BN+SiLU -> Upsample(1.25) => 20x20
    assert out.shape == (N, 256, 20, 20), out.shape
    assert bool(jnp.all(jnp.isfinite(out)))
    print("KERNEL_OK")
</pallas_src>

<mosaic_0001>
module attributes {stable_mosaic.version = 11 : i64} {
  func.func @_dpup_kernel(%arg0: i32, %arg1: memref<1x256x8xbf16, #tpu.memory_space<vmem>>, %arg2: memref<8x256xbf16, #tpu.memory_space<vmem>>, %arg3: memref<1x256xf32, #tpu.memory_space<vmem>>, %arg4: memref<400x256xbf16, #tpu.memory_space<vmem>>, %arg5: memref<1x400x256xf32, #tpu.memory_space<vmem>>) attributes {dimension_semantics = [#tpu.dimension_semantics<parallel>], iteration_bounds = array<i64: 2>, scalar_prefetch = 0 : i64, scratch_operands = 0 : i64, tpu.core_type = #tpu.core_type<tc>, window_params = [{transform_indices = @transform_0, window_bounds = array<i64: 1, 256, 8>}, {pipeline_mode = #tpu.pipeline_mode<synchronous>, transform_indices = @transform_1, window_bounds = array<i64: 8, 256>}, {pipeline_mode = #tpu.pipeline_mode<synchronous>, transform_indices = @transform_2, window_bounds = array<i64: 1, 256>}, {pipeline_mode = #tpu.pipeline_mode<synchronous>, transform_indices = @transform_3, window_bounds = array<i64: 400, 256>}, {transform_indices = @transform_4, window_bounds = array<i64: 1, 400, 256>}]} {
    %c0 = arith.constant 0 : index
    %c0_0 = arith.constant 0 : index
    %c0_1 = arith.constant 0 : index
    %0 = vector.load %arg1[%c0, %c0_0, %c0_1] : memref<1x256x8xbf16, #tpu.memory_space<vmem>>, vector<1x256x8xbf16>
    %1 = vector.shape_cast %0 : vector<1x256x8xbf16> to vector<256x8xbf16>
    %c0_2 = arith.constant 0 : index
    %c0_3 = arith.constant 0 : index
    %2 = vector.load %arg2[%c0_2, %c0_3] : memref<8x256xbf16, #tpu.memory_space<vmem>>, vector<8x256xbf16>
    %cst = arith.constant dense<0.000000e+00> : vector<256x256xf32>
    %3 = tpu.matmul %1, %2, %cst {dimension_numbers = #tpu.dot_dimension_numbers<[1], [0], [0], [1], [0, 0, 1, 1], [], []>} : vector<256x8xbf16>, vector<8x256xbf16>, vector<256x256xf32> -> vector<256x256xf32>
    %c0_4 = arith.constant 0 : index
    %c0_5 = arith.constant 0 : index
    %4 = vector.load %arg3[%c0_4, %c0_5] : memref<1x256xf32, #tpu.memory_space<vmem>>, vector<1x256xf32>
    %5 = vector.broadcast %4 : vector<1x256xf32> to vector<256x256xf32>
    %6 = arith.addf %3, %5 : vector<256x256xf32>
    %7 = arith.negf %6 : vector<256x256xf32>
    %8 = math.exp %7 : vector<256x256xf32>
    %cst_6 = arith.constant 1.000000e+00 : f32
    %9 = vector.broadcast %cst_6 : f32 to vector<256x256xf32>
    %10 = arith.addf %9, %8 : vector<256x256xf32>
    %11 = arith.divf %9, %10 : vector<256x256xf32>
    %12 = arith.mulf %6, %11 : vector<256x256xf32>
    %c0_7 = arith.constant 0 : index
    %c0_8 = arith.constant 0 : index
    %13 = vector.load %arg4[%c0_7, %c0_8] : memref<400x256xbf16, #tpu.memory_space<vmem>>, vector<400x256xbf16>
    %14 = arith.truncf %12 : vector<256x256xf32> to vector<256x256xbf16>
    %cst_9 = arith.constant dense<0.000000e+00> : vector<400x256xf32>
    %15 = tpu.matmul %13, %14, %cst_9 {dimension_numbers = #tpu.dot_dimension_numbers<[1], [0], [0], [1], [0, 0, 1, 1], [], []>} : vector<400x256xbf16>, vector<256x256xbf16>, vector<400x256xf32> -> vector<400x256xf32>
    %c0_10 = arith.constant 0 : index
    %c0_11 = arith.constant 0 : index
    %c0_12 = arith.constant 0 : index
    %16 = vector.load %arg5[%c0_10, %c0_11, %c0_12] : memref<1x400x256xf32, #tpu.memory_space<vmem>>, vector<1x400x256xf32>
    %17 = vector.shape_cast %16 : vector<1x400x256xf32> to vector<400x256xf32>
    %18 = vector.shape_cast %15 : vector<400x256xf32> to vector<1x400x256xf32>
    tpu.vector_store %arg5[%c0_10, %c0_11, %c0_12], %18 {strides = array<i32>} : memref<1x400x256xf32, #tpu.memory_space<vmem>>, vector<1x400x256xf32>,
    return
  }
  func.func @transform_0(%arg0: i32) -> (i32, i32, i32) {
    %c0_i32 = arith.constant 0 : i32
    %c0_i32_0 = arith.constant 0 : i32
    %c0_i32_1 = arith.constant 0 : i32
    return %arg0, %c0_i32, %c0_i32_0 : i32, i32, i32
  }
  func.func @transform_1(%arg0: i32) -> (i32, i32) {
    %c0_i32 = arith.constant 0 : i32
    %c0_i32_0 = arith.constant 0 : i32
    %c0_i32_1 = arith.constant 0 : i32
    return %c0_i32, %c0_i32_0 : i32, i32
  }
  func.func @transform_2(%arg0: i32) -> (i32, i32) {
    %c0_i32 = arith.constant 0 : i32
    %c0_i32_0 = arith.constant 0 : i32
    %c0_i32_1 = arith.constant 0 : i32
    return %c0_i32, %c0_i32_0 : i32, i32
  }
  func.func @transform_3(%arg0: i32) -> (i32, i32) {
    %c0_i32 = arith.constant 0 : i32
    %c0_i32_0 = arith.constant 0 : i32
    %c0_i32_1 = arith.constant 0 : i32
    return %c0_i32, %c0_i32_0 : i32, i32
  }
  func.func @transform_4(%arg0: i32) -> (i32, i32, i32) {
    %c0_i32 = arith.constant 0 : i32
    %c0_i32_0 = arith.constant 0 : i32
    %c0_i32_1 = arith.constant 0 : i32
    return %arg0, %c0_i32, %c0_i32_0 : i32, i32, i32
  }
}

</mosaic_0001>

<bundles_post_ra>
// kernel: dpup_forward.1
= control target key start
LH: loop header
LB: loop body
LE: loop exit
PB: predicated region body
PF: predicated region fallthrough
CT: control target
= control target key end

     0   :  { %s2381_s15 = smov 0   ;;  %s3018_s0 = inlined_call_operand.vmem [shape: bf16[2,256,8], index: 0, kind: input, shape index: {}]   ;;  %s3019_s1 = inlined_call_operand.vmem [shape: bf16[8,256], index: 1, kind: input, shape index: {}]   ;;  %s3020_s2 = inlined_call_operand.vmem [shape: f32[1,256], index: 2, kind: input, shape index: {}]   ;;  %s3021_s3 = inlined_call_operand.vmem [shape: bf16[400,256], index: 3, kind: input, shape index: {}]   ;;  %s3022_s4 = inlined_call_operand.vmem [shape: f32[2,400,256], index: 4, kind: output, shape index: {}]  }
   0x1 LB: > { %s1796_s16 = sadd.s32 4294967295, %s2353_s15   ;;  %p1800_p0 = scmp.ge.s32.totalorder %s2353_s15, 1  ;;  %s2353_s15 = sphi %s2381_s15, %s14_s15  }
   0x2   : > { %p162_p1 = scmp.lt.s32.totalorder %s2353_s15, 3 }
   0x4   : > { %p163_p2 = pnand %p1800_p0, %p162_p1 }
   0x5   : > { %v231_v0 = vld [vmem:[%s3019_s1] sm:$0xff] (!%p163_p2)  ;;  %vm378_vm0 = vcmask (!%p163_p2), 1043456   ;;  %p188_p3 = scmp.lt.s32.totalorder (!%p163_p2), %s1796_s16, 1  ;;  %v2355_v3 = vmov (!%p163_p2), 0   ;;  %vm329_vm1 = vcmask (!%p163_p2), 64512   ;;  %v234_v21 = vlaneseq (!%p163_p2) }
   0x6   : > { %166 = sbr.rel (%p163_p2) target bundleno = 736 (0x2e0), region = 36  ;;  %v1821_v1 = vcombine.high (!%p163_p2), %v231_v0, %v231_v0  ;;  %v1820_v2 = vcombine.low (!%p163_p2), %v231_v0, %v231_v0  ;;  %417 = vmatprep.mubr.bf16.mxu0 (!%p163_p2), %v2355_v3  ;;  %v232_v24 = vld [vmem:[%s3020_s2] sm:$0x3] (!%p163_p2) }
   0x7   : > { %v235_v22 = vshrl.u32 (!%p163_p2), %v234_v21, 7 }
   0x8   : > { %1822 = vmatprep.subr.msk.bf16.mxu0 (!%p163_p2), %vm378_vm0, %v1821_v1  ;;  %v380_v4 = vsel (!%p163_p2), %vm378_vm0, %v1820_v2, 0 }
   0x9   : > { %386 = vmatpush1.bf16.msra.mxu0 (!%p163_p2), %v380_v4  ;;  %v236_v23 = vsub.s32 (!%p163_p2), 0, %v235_v22  ;;  %v240_v25 = vsub.s32 (!%p163_p2), 1, %v235_v22 }
   0xb   : > { %v2435_v26 = vrot.slane (!%p163_p2), %v232_v24, %v236_v23  ;;  %v2437_v27 = vrot.slane (!%p163_p2), %v232_v24, %v240_v25 }
   0xd   : > { %s3024_s16 = smov (!%p188_p3, %s1796_s16), 1 }
   0xe   : > { %s1955_s19 = sshll.u32 %s3024_s16, 7  ;;  %s1988_s29 = smul.u32 800, %s3024_s16 }
   0xf   : > { %s2398_s22 = scalar_lea.vmem %s3018_s0, %s1955_s19 }
  0x10   : > { %v2000_v5 = vld [vmem:[%s2398_s22] sm:$0xff]   ;;  %v2001_v6 = vld [vmem:[%s2398_s22 + $0x8] sm:$0xff]   ;;  %v2002_v7 = vld [vmem:[%s2398_s22 + $0x10] sm:$0xff]   ;;  %s2913_s6 = scalar_lea.vmem %s3022_s4, %s1988_s29 }
  0x11   : > { %1823 = vmatmul.mubr.msk.bf16.vlgmr.msra.gmra.mrb[0].mxu0 %vm329_vm1, %v2000_v5  ;;  %v2003_v8 = vld [vmem:[%s2398_s22 + $0x18] sm:$0xff]   ;;  %v2004_v9 = vld [vmem:[%s2398_s22 + $0x20] sm:$0xff]   ;;  %v2005_v10 = vld [vmem:[%s2398_s22 + $0x28] sm:$0xff]  }
  0x12   : > { %427 = vmatprep.mubr.bf16.mxu0 %v2355_v3  ;;  %v2006_v11 = vld [vmem:[%s2398_s22 + $0x30] sm:$0xff]   ;;  %v2007_v12 = vld [vmem:[%s2398_s22 + $0x38] sm:$0xff]   ;;  %v2008_v13 = vld [vmem:[%s2398_s22 + $0x40] sm:$0xff]  }
  0x13   : > { %v2009_v14 = vld [vmem:[%s2398_s22 + $0x48] sm:$0xff]   ;;  %v2010_v15 = vld [vmem:[%s2398_s22 + $0x50] sm:$0xff]   ;;  %v2011_v16 = vld [vmem:[%s2398_s22 + $0x58] sm:$0xff]  }
  0x14   : > { %v2012_v17 = vld [vmem:[%s2398_s22 + $0x60] sm:$0xff]   ;;  %v2013_v18 = vld [vmem:[%s2398_s22 + $0x68] sm:$0xff]   ;;  %v2014_v19 = vld [vmem:[%s2398_s22 + $0x70] sm:$0xff]  }
  0x15   : > { %v2015_v20 = vld [vmem:[%s2398_s22 + $0x78] sm:$0xff]  }
  0x19   : > { %1824 = vmatmul.mubr.msk.bf16.gmra.mrb[4].mxu0 %vm329_vm1, %v2001_v6 }
  0x1a   : > { %437 = vmatprep.mubr.bf16.mxu0 %v2355_v3 }
  0x21   : > { %1825 = vmatmul.mubr.msk.bf16.gmra.mrb[8].mxu0 %vm329_vm1, %v2002_v7 }
  0x22   : > { %447 = vmatprep.mubr.bf16.mxu0 %v2355_v3 }
  0x29   : > { %1826 = vmatmul.mubr.msk.bf16.gmra.mrb[12].mxu0 %vm329_vm1, %v2003_v8 }
  0x2a   : > { %457 = vmatprep.mubr.bf16.mxu0 %v2355_v3 }
  0x31   : > { %1827 = vmatmul.mubr.msk.bf16.gmra.mrb[16].mxu0 %vm329_vm1, %v2004_v9 }
  0x32   : > { %467 = vmatprep.mubr.bf16.mxu0 %v2355_v3 }
  0x39   : > { %1828 = vmatmul.mubr.msk.bf16.gmra.mrb[20].mxu0 %vm329_vm1, %v2005_v10 }
  0x3a   : > { %477 = vmatprep.mubr.bf16.mxu0 %v2355_v3 }
  0x41   : > { %1829 = vmatmul.mubr.msk.bf16.gmra.mrb[24].mxu0 %vm329_vm1, %v2006_v11 }
  0x42   : > { %487 = vmatprep.mubr.bf16.mxu0 %v2355_v3 }
  0x49   : > { %1830 = vmatmul.mubr.msk.bf16.gmra.mrb[28].mxu0 %vm329_vm1, %v2007_v12 }
  0x4a   : > { %497 = vmatprep.mubr.bf16.mxu0 %v2355_v3 }
  0x51   : > { %1831 = vmatmul.mubr.msk.bf16.gmra.mrb[32].mxu0 %vm329_vm1, %v2008_v13 }
  0x52   : > { %507 = vmatprep.mubr.bf16.mxu0 %v2355_v3 }
  0x59   : > { %1832 = vmatmul.mubr.msk.bf16.gmra.mrb[36].mxu0 %vm329_vm1, %v2009_v14 }
  0x5a   : > { %517 = vmatprep.mubr.bf16.mxu0 %v2355_v3 }
  0x61   : > { %1833 = vmatmul.mubr.msk.bf16.gmra.mrb[40].mxu0 %vm329_vm1, %v2010_v15 }
  0x62   : > { %527 = vmatprep.mubr.bf16.mxu0 %v2355_v3 }
  0x69   : > { %1834 = vmatmul.mubr.msk.bf16.gmra.mrb[44].mxu0 %vm329_vm1, %v2011_v16 }
  0x6a   : > { %537 = vmatprep.mubr.bf16.mxu0 %v2355_v3 }
  0x71   : > { %1835 = vmatmul.mubr.msk.bf16.gmra.mrb[48].mxu0 %vm329_vm1, %v2012_v17 }
  0x72   : > { %547 = vmatprep.mubr.bf16.mxu0 %v2355_v3 }
  0x79   : > { %1836 = vmatmul.mubr.msk.bf16.gmra.mrb[52].mxu0 %vm329_vm1, %v2013_v18 }
  0x7a   : > { %557 = vmatprep.mubr.bf16.mxu0 %v2355_v3 }
  0x81   : > { %1837 = vmatmul.mubr.msk.bf16.gmra.mrb[56].mxu0 %vm329_vm1, %v2014_v19 }
  0x82   : > { %567 = vmatprep.mubr.bf16.mxu0 %v2355_v3 }
  0x89   : > { %1838 = vmatmul.mubr.msk.bf16.gmra.mrb[60].mxu0 %vm329_vm1, %v2015_v20 }
  0xe4   : > { %v419_v28 = vpop.f32.mrb[0].mxu0 }
  0xe5   : > { %v2440_v29 = vadd.f32 %v419_v28, %v2435_v26  ;;  %v421_v30 = vpop.f32.mrb[1].mxu0 }
  0xe6   : > { %v2443_v31 = vadd.f32 %v421_v30, %v2437_v27  ;;  %v423_v32 = vpop.f32.mrb[2].mxu0 }
  0xe7   : > { %v1839_v33 = vmul.f32 -1.442695, %v2440_v29  ;;  %v2447_v34 = vadd.f32 %v423_v32, %v2435_v26  ;;  %v425_v35 = vpop.f32.mrb[3].mxu0 }
  0xe8   : > { %v1840_v36 = vmul.f32 -1.442695, %v2443_v31  ;;  %v2451_v37 = vadd.f32 %v425_v35, %v2437_v27 }
  0xe9   : > { %2091 = vpow2.f32 %v1839_v33  ;;  %v1841_v38 = vmul.f32 -1.442695, %v2447_v34 }
  0xea   : > { %2093 = vpow2.f32 %v1840_v36  ;;  %v1842_v39 = vmul.f32 -1.442695, %v2451_v37 }
  0xeb   : > { %2095 = vpow2.f32 %v1841_v38 }
  0xec   : > { %2097 = vpow2.f32 %v1842_v39  ;;  %v429_v40 = vpop.f32.mrb[4].mxu0 }
  0xed   : > { %v2456_v41 = vadd.f32 %v429_v40, %v2435_v26  ;;  %v431_v42 = vpop.f32.mrb[5].mxu0 }
  0xee   : > { %v2459_v43 = vadd.f32 %v431_v42, %v2437_v27  ;;  %v433_v44 = vpop.f32.mrb[6].mxu0 }
  0xef   : > { %v1843_v45 = vmul.f32 -1.442695, %v2456_v41  ;;  %v2463_v46 = vadd.f32 %v433_v44, %v2435_v26  ;;  %v435_v47 = vpop.f32.mrb[7].mxu0 }
  0xf0   : > { %v1844_v48 = vmul.f32 -1.442695, %v2459_v43  ;;  %v2467_v49 = vadd.f32 %v435_v47, %v2437_v27 }
  0xf1   : > { %2099 = vpow2.f32 %v1843_v45  ;;  %v1845_v50 = vmul.f32 -1.442695, %v2463_v46 }
  0xf2   : > { %2101 = vpow2.f32 %v1844_v48  ;;  %v1846_v51 = vmul.f32 -1.442695, %v2467_v49 }
  0xf3   : > { %v2092_v52 = vpop.eup %2091  ;;  %2103 = vpow2.f32 %v1845_v50 }
  0xf4   : > { %v2094_v53 = vpop.eup %2093  ;;  %v770_v54 = vadd.f32 1.0, %v2092_v52  ;;  %2105 = vpow2.f32 %v1846_v51  ;;  %v439_v55 = vpop.f32.mrb[8].mxu0 }
  0xf5   : > { %v2096_v56 = vpop.eup %2095  ;;  %v771_v57 = vadd.f32 1.0, %v2094_v53  ;;  %v2472_v58 = vadd.f32 %v439_v55, %v2435_v26  ;;  %v441_v59 = vpop.f32.mrb[9].mxu0 }
  0xf6   : > { %v2098_v60 = vpop.eup %2097  ;;  %2107 = vrcp.f32 %v770_v54  ;;  %v772_v61 = vadd.f32 1.0, %v2096_v56  ;;  %v2475_v62 = vadd.f32 %v441_v59, %v2437_v27  ;;  %v443_v63 = vpop.f32.mrb[10].mxu0 }
  0xf7   : > { %2109 = vrcp.f32 %v771_v57  ;;  %v773_v0 = vadd.f32 1.0, %v2098_v60  ;;  %v1847_v1 = vmul.f32 -1.442695, %v2472_v58  ;;  %v2479_v2 = vadd.f32 %v443_v63, %v2435_v26  ;;  %v445_v3 = vpop.f32.mrb[11].mxu0 }
  0xf8   : > { %2111 = vrcp.f32 %v772_v61  ;;  %v1848_v4 = vmul.f32 -1.442695, %v2475_v62  ;;  %v2483_v5 = vadd.f32 %v445_v3, %v2437_v27 }
  0xf9   : > { %2113 = vrcp.f32 %v773_v0  ;;  %v1849_v6 = vmul.f32 -1.442695, %v2479_v2 }
  0xfa   : > { %2115 = vpow2.f32 %v1847_v1  ;;  %v1850_v7 = vmul.f32 -1.442695, %v2483_v5  ;;  %v2018_v1 = vld [vmem:[%s3021_s3 + $0x84] ss:$8 sps:$4 sm:$0xff]  }
  0xfb   : > { %v2100_v8 = vpop.eup %2099  ;;  %2117 = vpow2.f32 %v1848_v4  ;;  %1470 = vmatprep.mubr.bf16.mxu1 %v2018_v1 }
  0xfc   : > { %v2102_v9 = vpop.eup %2101  ;;  %v774_v10 = vadd.f32 1.0, %v2100_v8  ;;  %2119 = vpow2.f32 %v1849_v6  ;;  %v449_v11 = vpop.f32.mrb[12].mxu0 }
  0xfd   : > { %v2104_v12 = vpop.eup %2103  ;;  %v775_v13 = vadd.f32 1.0, %v2102_v9  ;;  %2121 = vpow2.f32 %v1850_v7  ;;  %v2488_v14 = vadd.f32 %v449_v11, %v2435_v26  ;;  %v451_v15 = vpop.f32.mrb[13].mxu0 }
  0xfe   : > { %v2106_v16 = vpop.eup %2105  ;;  %2123 = vrcp.f32 %v774_v10  ;;  %v776_v17 = vadd.f32 1.0, %v2104_v12  ;;  %v2491_v18 = vadd.f32 %v451_v15, %v2437_v27  ;;  %v453_v19 = vpop.f32.mrb[14].mxu0 }
  0xff   : > { %2125 = vrcp.f32 %v775_v13  ;;  %v777_v20 = vadd.f32 1.0, %v2106_v16  ;;  %v1851_v21 = vmul.f32 -1.442695, %v2488_v14  ;;  %v2495_v22 = vadd.f32 %v453_v19, %v2435_v26  ;;  %v455_v23 = vpop.f32.mrb[15].mxu0 }
 0x100   : > { %v2108_v24 = vpop.eup %2107  ;;  %2127 = vrcp.f32 %v776_v17  ;;  %v1852_v25 = vmul.f32 -1.442695, %v2491_v18  ;;  %v2499_v28 = vadd.f32 %v455_v23, %v2437_v27 }
 0x101   : > { %v2110_v30 = vpop.eup %2109  ;;  %2129 = vrcp.f32 %v777_v20  ;;  %v1853_v32 = vmul.f32 -1.442695, %v2495_v22  ;;  %v962_v38 = vmul.f32 %v2108_v24, %v2440_v29 }
 0x102   : > { %v2112_v33 = vpop.eup %2111  ;;  %2131 = vpow2.f32 %v1851_v21  ;;  %v1854_v35 = vmul.f32 -1.442695, %v2499_v28  ;;  %v963_v42 = vmul.f32 %v2110_v30, %v2443_v31 }
 0x103   : > { %v2114_v36 = vpop.eup %2113  ;;  %v964_v39 = vmul.f32 %v2112_v33, %v2447_v34  ;;  %2133 = vpow2.f32 %v1852_v25 }
 0x104   : > { %v2116_v40 = vpop.eup %2115  ;;  %v965_v44 = vmul.f32 %v2114_v36, %v2451_v37  ;;  %2135 = vpow2.f32 %v1853_v32  ;;  %v459_v45 = vpop.f32.mrb[16].mxu0 }
 0x105   : > { %v2118_v47 = vpop.eup %2117  ;;  %v1076_v48 = vpack.c.bf16 %v964_v39, %v962_v38  ;;  %v778_v50 = vadd.f32 1.0, %v2116_v40  ;;  %2137 = vpow2.f32 %v1854_v35  ;;  %v2508_v51 = vadd.f32 %v459_v45, %v2435_v26  ;;  %v461_v52 = vpop.f32.mrb[17].mxu0 }
 0x106   : > { %v2120_v53 = vpop.eup %2119  ;;  %v779_v29 = vadd.f32 1.0, %v2118_v47  ;;  %v2511_v34 = vadd.f32 %v461_v52, %v2437_v27  ;;  %v463_v54 = vpop.f32.mrb[18].mxu0  ;;  %v1077_v55 = vpack.c.bf16 %v965_v44, %v963_v42 }
 0x107   : > { %v2122_v31 = vpop.eup %2121  ;;  %2139 = vrcp.f32 %v778_v50  ;;  %v780_v37 = vadd.f32 1.0, %v2120_v53  ;;  %v1855_v56 = vmul.f32 -1.442695, %v2508_v51  ;;  %v2515_v57 = vadd.f32 %v463_v54, %v2435_v26  ;;  %v465_v59 = vpop.f32.mrb[19].mxu0 }
 0x108   : > { %v2124_v60 = vpop.eup %2123  ;;  %2141 = vrcp.f32 %v779_v29  ;;  %v781_v61 = vadd.f32 1.0, %v2122_v31  ;;  %v1856_v63 = vmul.f32 -1.442695, %v2511_v34  ;;  %v2519_v0 = vadd.f32 %v465_v59, %v2437_v27  ;;  %1358 = vmatprep.subr.bf16.mxu0 %v1077_v55  ;;  %1956 = vmatprep.subr.bf16.mxu1 %v1077_v55 }
 0x109   : > { %v2126_v3 = vpop.eup %2125  ;;  %2143 = vrcp.f32 %v780_v37  ;;  %v1857_v4 = vmul.f32 -1.442695, %v2515_v57  ;;  %1359 = vmatpush1.bf16.msra.mxu0 %v1076_v48  ;;  %1972 = vmatpush1.bf16.msra.mxu1 %v1076_v48  ;;  %v966_v9 = vmul.f32 %v2124_v60, %v2456_v41 }
 0x10a   : > { %v2128_v6 = vpop.eup %2127  ;;  %2145 = vrcp.f32 %v781_v61  ;;  %v1858_v7 = vmul.f32 -1.442695, %v2519_v0  ;;  %v967_v12 = vmul.f32 %v2126_v3, %v2459_v43 }
 0x10b   : > { %v2130_v8 = vpop.eup %2129  ;;  %v968_v10 = vmul.f32 %v2128_v6, %v2463_v46  ;;  %2147 = vpow2.f32 %v1855_v56 }
 0x10c   : > { %v2132_v11 = vpop.eup %2131  ;;  %v969_v13 = vmul.f32 %v2130_v8, %v2467_v49  ;;  %2149 = vpow2.f32 %v1856_v63  ;;  %v469_v15 = vpop.f32.mrb[20].mxu0 }
 0x10d   : > { %v2134_v16 = vpop.eup %2133  ;;  %v1078_v17 = vpack.c.bf16 %v968_v10, %v966_v9  ;;  %v782_v19 = vadd.f32 1.0, %v2132_v11  ;;  %2151 = vpow2.f32 %v1857_v4  ;;  %v2531_v20 = vadd.f32 %v469_v15, %v2435_v26  ;;  %v471_v21 = vpop.f32.mrb[21].mxu0 }
 0x10e   : > { %v2136_v23 = vpop.eup %2135  ;;  %v783_v41 = vadd.f32 1.0, %v2134_v16  ;;  %2153 = vpow2.f32 %v1858_v7  ;;  %v2534_v46 = vadd.f32 %v471_v21, %v2437_v27  ;;  %v473_v24 = vpop.f32.mrb[22].mxu0  ;;  %v1079_v43 = vpack.c.bf16 %v969_v13, %v967_v12 }
 0x10f   : > { %v2138_v25 = vpop.eup %2137  ;;  %2155 = vrcp.f32 %v782_v19  ;;  %v784_v49 = vadd.f32 1.0, %v2136_v23  ;;  %v1859_v30 = vmul.f32 -1.442695, %v2531_v20  ;;  %v2538_v32 = vadd.f32 %v473_v24, %v2435_v26  ;;  %v475_v33 = vpop.f32.mrb[23].mxu0 }
 0x110   : > { %2157 = vrcp.f32 %v783_v41  ;;  %v785_v35 = vadd.f32 1.0, %v2138_v25  ;;  %v1860_v36 = vmul.f32 -1.442695, %v2534_v46  ;;  %v2542_v38 = vadd.f32 %v475_v33, %v2437_v27  ;;  %1360 = vmatprep.subr.bf16.mxu0 %v1079_v43  ;;  %1957 = vmatprep.subr.bf16.mxu1 %v1079_v43 }
 0x111   : > { %v2140_v39 = vpop.eup %2139  ;;  %2159 = vrcp.f32 %v784_v49  ;;  %v1861_v40 = vmul.f32 -1.442695, %v2538_v32  ;;  %1361 = vmatpush1.bf16.msra.mxu0 %v1078_v17  ;;  %1973 = vmatpush1.bf16.msra.mxu1 %v1078_v17 }
 0x112   : > { %v2142_v42 = vpop.eup %2141  ;;  %2161 = vrcp.f32 %v785_v35  ;;  %v1862_v44 = vmul.f32 -1.442695, %v2542_v38  ;;  %v970_v48 = vmul.f32 %v2140_v39, %v2472_v58 }
 0x113   : > { %v2144_v45 = vpop.eup %2143  ;;  %2163 = vpow2.f32 %v1859_v30  ;;  %v971_v29 = vmul.f32 %v2142_v42, %v2475_v62 }
 0x114   : > { %v2146_v47 = vpop.eup %2145  ;;  %v972_v50 = vmul.f32 %v2144_v45, %v2479_v2  ;;  %2165 = vpow2.f32 %v1860_v36  ;;  %v479_v52 = vpop.f32.mrb[24].mxu0 }
 0x115   : > { %v2148_v53 = vpop.eup %2147  ;;  %v973_v54 = vmul.f32 %v2146_v47, %v2483_v5  ;;  %2167 = vpow2.f32 %v1861_v40  ;;  %v2551_v55 = vadd.f32 %v479_v52, %v2435_v26  ;;  %v481_v31 = vpop.f32.mrb[25].mxu0 }
 0x116   : > { %v2150_v37 = vpop.eup %2149  ;;  %v1080_v56 = vpack.c.bf16 %v972_v50, %v970_v48  ;;  %v786_v59 = vadd.f32 1.0, %v2148_v53  ;;  %2169 = vpow2.f32 %v1862_v44  ;;  %v2554_v58 = vadd.f32 %v481_v31, %v2437_v27  ;;  %v483_v2 = vpop.f32.mrb[26].mxu0 }
 0x117   : > { %v2152_v60 = vpop.eup %2151  ;;  %v787_v61 = vadd.f32 1.0, %v2150_v37  ;;  %v2557_v63 = vadd.f32 %v483_v2, %v2435_v26  ;;  %v485_v62 = vpop.f32.mrb[27].mxu0  ;;  %v1081_v5 = vpack.c.bf16 %v973_v54, %v971_v29  ;;  %v1863_v4 = vmul.f32 -1.442695, %v2551_v55 }
 0x118   : > { %v2154_v1 = vpop.eup %2153  ;;  %2171 = vrcp.f32 %v786_v59  ;;  %v788_v3 = vadd.f32 1.0, %v2152_v60  ;;  %v2561_v6 = vadd.f32 %v485_v62, %v2437_v27  ;;  %v1864_v9 = vmul.f32 -1.442695, %v2554_v58 }
 0x119   : > { %v2156_v7 = vpop.eup %2155  ;;  %2173 = vrcp.f32 %v787_v61  ;;  %v789_v8 = vadd.f32 1.0, %v2154_v1  ;;  %1362 = vmatprep.subr.bf16.mxu0 %v1081_v5  ;;  %1958 = vmatprep.subr.bf16.mxu1 %v1081_v5  ;;  %v1865_v11 = vmul.f32 -1.442695, %v2557_v63 }
 0x11a   : > { %v2158_v10 = vpop.eup %2157  ;;  %2175 = vrcp.f32 %v788_v3  ;;  %1363 = vmatpush1.bf16.msra.mxu0 %v1080_v56  ;;  %1974 = vmatpush1.bf16.msra.mxu1 %v1080_v56  ;;  %v1866_v13 = vmul.f32 -1.442695, %v2561_v6  ;;  %v974_v16 = vmul.f32 %v2156_v7, %v2488_v14 }
 0x11b   : > { %v2160_v12 = vpop.eup %2159  ;;  %2177 = vrcp.f32 %v789_v8 }
 0x11c   : > { %v2162_v15 = vpop.eup %2161  ;;  %v976_v17 = vmul.f32 %v2160_v12, %v2495_v22  ;;  %2179 = vpow2.f32 %v1863_v4  ;;  %v489_v19 = vpop.f32.mrb[28].mxu0  ;;  %v975_v22 = vmul.f32 %v2158_v10, %v2491_v18 }
 0x11d   : > { %v2164_v21 = vpop.eup %2163  ;;  %v977_v23 = vmul.f32 %v2162_v15, %v2499_v28  ;;  %2181 = vpow2.f32 %v1864_v9  ;;  %v2570_v41 = vadd.f32 %v489_v19, %v2435_v26  ;;  %v491_v24 = vpop.f32.mrb[29].mxu0 }
 0x11e   : > { %v2166_v43 = vpop.eup %2165  ;;  %v1082_v25 = vpack.c.bf16 %v976_v17, %v974_v16  ;;  %v790_v49 = vadd.f32 1.0, %v2164_v21  ;;  %2183 = vpow2.f32 %v1865_v11  ;;  %v2573_v30 = vadd.f32 %v491_v24, %v2437_v27  ;;  %v493_v14 = vpop.f32.mrb[30].mxu0 }
 0x11f   : > { %v2168_v33 = vpop.eup %2167  ;;  %v791_v35 = vadd.f32 1.0, %v2166_v43  ;;  %2185 = vpow2.f32 %v1866_v13  ;;  %v2577_v28 = vadd.f32 %v493_v14, %v2435_v26  ;;  %v495_v36 = vpop.f32.mrb[31].mxu0  ;;  %v1867_v42 = vmul.f32 -1.442695, %v2570_v41 }
 0x120   : > { %v2170_v39 = vpop.eup %2169  ;;  %2187 = vrcp.f32 %v790_v49  ;;  %v792_v40 = vadd.f32 1.0, %v2168_v33  ;;  %v2581_v44 = vadd.f32 %v495_v36, %v2437_v27  ;;  %v1868_v47 = vmul.f32 -1.442695, %v2573_v30 }
 0x121   : > { %2189 = vrcp.f32 %v791_v35  ;;  %v793_v45 = vadd.f32 1.0, %v2170_v39  ;;  %v1083_v48 = vpack.c.bf16 %v977_v23, %v975_v22  ;;  %v1869_v50 = vmul.f32 -1.442695, %v2577_v28 }
 0x122   : > { %v2172_v18 = vpop.eup %2171  ;;  %2191 = vrcp.f32 %v792_v40  ;;  %v1870_v53 = vmul.f32 -1.442695, %v2581_v44 }
 0x123   : > { %v2174_v52 = vpop.eup %2173  ;;  %2193 = vrcp.f32 %v793_v45  ;;  %1364 = vmatprep.subr.bf16.mxu0 %v1083_v48  ;;  %1959 = vmatprep.subr.bf16.mxu1 %v1083_v48  ;;  %v978_v37 = vmul.f32 %v2172_v18, %v2508_v51 }
 0x124   : > { %v2176_v29 = vpop.eup %2175  ;;  %2195 = vpow2.f32 %v1867_v42  ;;  %1365 = vmatpush1.bf16.msra.mxu0 %v1082_v25  ;;  %1975 = vmatpush1.bf16.msra.mxu1 %v1082_v25  ;;  %v499_v54 = vpop.f32.mrb[32].mxu0  ;;  %v979_v3 = vmul.f32 %v2174_v52, %v2511_v34 }
 0x125   : > { %v2178_v31 = vpop.eup %2177  ;;  %v980_v56 = vmul.f32 %v2176_v29, %v2515_v57  ;;  %2197 = vpow2.f32 %v1868_v47  ;;  %v2589_v59 = vadd.f32 %v499_v54, %v2435_v26  ;;  %v501_v2 = vpop.f32.mrb[33].mxu0 }
 0x126   : > { %v2180_v60 = vpop.eup %2179  ;;  %v981_v61 = vmul.f32 %v2178_v31, %v2519_v0  ;;  %2199 = vpow2.f32 %v1869_v50  ;;  %v2593_v62 = vadd.f32 %v501_v2, %v2437_v27  ;;  %v503_v5 = vpop.f32.mrb[34].mxu0 }
 0x127   : > { %v2182_v1 = vpop.eup %2181  ;;  %v1084_v4 = vpack.c.bf16 %v980_v56, %v978_v37  ;;  %v794_v51 = vadd.f32 1.0, %v2180_v60  ;;  %2201 = vpow2.f32 %v1870_v53  ;;  %v505_v57 = vpop.f32.mrb[35].mxu0  ;;  %v2597_v9 = vadd.f32 %v503_v5, %v2435_v26 }
 0x128   : > { %v2184_v7 = vpop.eup %2183  ;;  %v795_v8 = vadd.f32 1.0, %v2182_v1  ;;  %v2600_v10 = vadd.f32 %v505_v57, %v2437_v27  ;;  %v1871_v12 = vmul.f32 -1.442695, %v2589_v59  ;;  %v1085_v13 = vpack.c.bf16 %v981_v61, %v979_v3 }
 0x129   : > { %v2186_v0 = vpop.eup %2185  ;;  %2203 = vrcp.f32 %v794_v51  ;;  %v796_v11 = vadd.f32 1.0, %v2184_v7  ;;  %v1872_v16 = vmul.f32 -1.442695, %v2593_v62  ;;  %v1873_v19 = vmul.f32 -1.442695, %v2597_v9 }
 0x12a   : > { %v2188_v15 = vpop.eup %2187  ;;  %2205 = vrcp.f32 %v795_v8  ;;  %v797_v34 = vadd.f32 1.0, %v2186_v0  ;;  %1366 = vmatprep.subr.bf16.mxu0 %v1085_v13  ;;  %1960 = vmatprep.subr.bf16.mxu1 %v1085_v13  ;;  %v1874_v23 = vmul.f32 -1.442695, %v2600_v10 }
 0x12b   : > { %v2190_v17 = vpop.eup %2189  ;;  %2207 = vrcp.f32 %v796_v11  ;;  %1367 = vmatpush1.bf16.msra.mxu0 %v1084_v4  ;;  %1976 = vmatpush1.bf16.msra.mxu1 %v1084_v4  ;;  %v982_v25 = vmul.f32 %v2188_v15, %v2531_v20 }
 0x12c   : > { %v2192_v21 = vpop.eup %2191  ;;  %2209 = vrcp.f32 %v797_v34  ;;  %v509_v24 = vpop.f32.mrb[36].mxu0  ;;  %v983_v42 = vmul.f32 %v2190_v17, %v2534_v46 }
 0x12d   : > { %v2194_v43 = vpop.eup %2193  ;;  %v984_v49 = vmul.f32 %v2192_v21, %v2538_v32  ;;  %2211 = vpow2.f32 %v1871_v12  ;;  %v2609_v14 = vadd.f32 %v509_v24, %v2435_v26  ;;  %v511_v33 = vpop.f32.mrb[37].mxu0 }
 0x12e   : > { %v2196_v22 = vpop.eup %2195  ;;  %v985_v35 = vmul.f32 %v2194_v43, %v2542_v38  ;;  %2213 = vpow2.f32 %v1872_v16  ;;  %v2613_v36 = vadd.f32 %v511_v33, %v2437_v27  ;;  %v513_v39 = vpop.f32.mrb[38].mxu0 }
 0x12f   : > { %v2198_v40 = vpop.eup %2197  ;;  %v1086_v45 = vpack.c.bf16 %v984_v49, %v982_v25  ;;  %v798_v20 = vadd.f32 1.0, %v2196_v22  ;;  %2215 = vpow2.f32 %v1873_v19  ;;  %v515_v32 = vpop.f32.mrb[39].mxu0  ;;  %v1875_v18 = vmul.f32 -1.442695, %v2609_v14 }
 0x130   : > { %v2200_v47 = vpop.eup %2199  ;;  %v799_v48 = vadd.f32 1.0, %v2198_v40  ;;  %2217 = vpow2.f32 %v1874_v23  ;;  %v2618_v50 = vadd.f32 %v513_v39, %v2435_v26  ;;  %v2621_v53 = vadd.f32 %v515_v32, %v2437_v27 }
 0x131   : > { %v2202_v38 = vpop.eup %2201  ;;  %2219 = vrcp.f32 %v798_v20  ;;  %v800_v52 = vadd.f32 1.0, %v2200_v47  ;;  %v1087_v29 = vpack.c.bf16 %v985_v35, %v983_v42  ;;  %v1876_v54 = vmul.f32 -1.442695, %v2613_v36 }
 0x132   : > { %2221 = vrcp.f32 %v799_v48  ;;  %v801_v46 = vadd.f32 1.0, %v2202_v38  ;;  %v1877_v37 = vmul.f32 -1.442695, %v2618_v50  ;;  %v1878_v2 = vmul.f32 -1.442695, %v2621_v53 }
 0x133   : > { %v2204_v31 = vpop.eup %2203  ;;  %2223 = vrcp.f32 %v800_v52  ;;  %1368 = vmatprep.subr.bf16.mxu0 %v1087_v29  ;;  %1961 = vmatprep.subr.bf16.mxu1 %v1087_v29 }
 0x134   : > { %v2206_v56 = vpop.eup %2205  ;;  %2225 = vrcp.f32 %v801_v46  ;;  %1369 = vmatpush1.bf16.msra.mxu0 %v1086_v45  ;;  %1977 = vmatpush1.bf16.msra.mxu1 %v1086_v45  ;;  %v519_v60 = vpop.f32.mrb[40].mxu0  ;;  %v986_v4 = vmul.f32 %v2204_v31, %v2551_v55 }
 0x135   : > { %v2208_v61 = vpop.eup %2207  ;;  %2227 = vpow2.f32 %v1875_v18  ;;  %v2627_v5 = vadd.f32 %v519_v60, %v2435_v26  ;;  %v521_v1 = vpop.f32.mrb[41].mxu0  ;;  %v987_v55 = vmul.f32 %v2206_v56, %v2554_v58 }
 0x136   : > { %v2210_v3 = vpop.eup %2209  ;;  %v988_v51 = vmul.f32 %v2208_v61, %v2557_v63  ;;  %2229 = vpow2.f32 %v1876_v54  ;;  %v2632_v57 = vadd.f32 %v521_v1, %v2437_v27  ;;  %v523_v7 = vpop.f32.mrb[42].mxu0 }
 0x137   : > { %v2212_v8 = vpop.eup %2211  ;;  %v989_v0 = vmul.f32 %v2210_v3, %v2561_v6  ;;  %2231 = vpow2.f32 %v1877_v37  ;;  %v1879_v11 = vmul.f32 -1.442695, %v2627_v5  ;;  %v2637_v12 = vadd.f32 %v523_v7, %v2435_v26  ;;  %v525_v13 = vpop.f32.mrb[43].mxu0 }
 0x138   : > { %v2214_v15 = vpop.eup %2213  ;;  %v1088_v34 = vpack.c.bf16 %v988_v51, %v986_v4  ;;  %v802_v63 = vadd.f32 1.0, %v2212_v8  ;;  %2233 = vpow2.f32 %v1878_v2  ;;  %v2641_v19 = vadd.f32 %v525_v13, %v2437_v27 }
 0x139   : > { %v2216_v16 = vpop.eup %2215  ;;  %v803_v17 = vadd.f32 1.0, %v2214_v15  ;;  %2235 = vpow2.f32 %v1879_v11  ;;  %v1880_v23 = vmul.f32 -1.442695, %v2632_v57  ;;  %v1089_v24 = vpack.c.bf16 %v989_v0, %v987_v55 }
 0x13a   : > { %v2218_v6 = vpop.eup %2217  ;;  %2237 = vrcp.f32 %v802_v63  ;;  %v804_v21 = vadd.f32 1.0, %v2216_v16  ;;  %v1881_v58 = vmul.f32 -1.442695, %v2637_v12  ;;  %v1882_v33 = vmul.f32 -1.442695, %v2641_v19 }
 0x13b   : > { %v2220_v43 = vpop.eup %2219  ;;  %2239 = vrcp.f32 %v803_v17  ;;  %v805_v25 = vadd.f32 1.0, %v2218_v6  ;;  %1370 = vmatprep.subr.bf16.mxu0 %v1089_v24  ;;  %1962 = vmatprep.subr.bf16.mxu1 %v1089_v24 }
 0x13c   : > { %v2222_v49 = vpop.eup %2221  ;;  %2241 = vrcp.f32 %v804_v21  ;;  %v529_v22 = vpop.f32.mrb[44].mxu0  ;;  %1371 = vmatpush1.bf16.msra.mxu0 %v1088_v34  ;;  %1978 = vmatpush1.bf16.msra.mxu1 %v1088_v34  ;;  %v990_v45 = vmul.f32 %v2220_v43, %v2570_v41 }
 0x13d   : > { %v2224_v35 = vpop.eup %2223  ;;  %2243 = vrcp.f32 %v805_v25  ;;  %v2647_v39 = vadd.f32 %v529_v22, %v2435_v26  ;;  %v531_v40 = vpop.f32.mrb[45].mxu0  ;;  %v991_v20 = vmul.f32 %v2222_v49, %v2573_v30 }
 0x13e   : > { %v2226_v42 = vpop.eup %2225  ;;  %v992_v32 = vmul.f32 %v2224_v35, %v2577_v28  ;;  %2245 = vpow2.f32 %v1880_v23  ;;  %v533_v47 = vpop.f32.mrb[46].mxu0  ;;  %v2655_v52 = vadd.f32 %v531_v40, %v2437_v27 }
 0x13f   : > { %v2228_v48 = vpop.eup %2227  ;;  %v993_v18 = vmul.f32 %v2226_v42, %v2581_v44  ;;  %2247 = vpow2.f32 %v1881_v58  ;;  %v1883_v38 = vmul.f32 -1.442695, %v2647_v39  ;;  %v535_v29 = vpop.f32.mrb[47].mxu0  ;;  %v2658_v41 = vadd.f32 %v533_v47, %v2435_v26  ;;  %v2045_v42 = vld [vmem:[%s3021_s3 + $0x4] ss:$8 sps:$4 sm:$0xff]  }
 0x140   : > { %v2230_v46 = vpop.eup %2229  ;;  %v1090_v54 = vpack.c.bf16 %v992_v32, %v990_v45  ;;  %v806_v31 = vadd.f32 1.0, %v2228_v48  ;;  %2249 = vpow2.f32 %v1882_v33  ;;  %v2661_v37 = vadd.f32 %v535_v29, %v2437_v27  ;;  %1390 = vmatprep.mubr.bf16.mxu0 %v2045_v42 }
 0x141   : > { %v2232_v30 = vpop.eup %2231  ;;  %v807_v28 = vadd.f32 1.0, %v2230_v46  ;;  %2251 = vpow2.f32 %v1883_v38  ;;  %v1091_v2 = vpack.c.bf16 %v993_v18, %v991_v20  ;;  %v1884_v1 = vmul.f32 -1.442695, %v2655_v52 }
 0x142   : > { %v2234_v44 = vpop.eup %2233  ;;  %2253 = vrcp.f32 %v806_v31  ;;  %v808_v56 = vadd.f32 1.0, %v2232_v30  ;;  %v1885_v51 = vmul.f32 -1.442695, %v2658_v41  ;;  %v1886_v0 = vmul.f32 -1.442695, %v2661_v37 }
 0x143   : > { %v2236_v60 = vpop.eup %2235  ;;  %2255 = vrcp.f32 %v807_v28  ;;  %v809_v61 = vadd.f32 1.0, %v2234_v44  ;;  %1372 = vmatprep.subr.bf16.mxu0 %v1091_v2  ;;  %1963 = vmatprep.subr.bf16.mxu1 %v1091_v2 }
 0x144   : > { %v2238_v3 = vpop.eup %2237  ;;  %2257 = vrcp.f32 %v808_v56  ;;  %v810_v4 = vadd.f32 1.0, %v2236_v60  ;;  %v539_v7 = vpop.f32.mrb[48].mxu0  ;;  %1373 = vmatpush1.bf16.msra.mxu0 %v1090_v54  ;;  %1979 = vmatpush1.bf16.msra.mxu1 %v1090_v54 }
 0x145   : > { %v2240_v8 = vpop.eup %2239  ;;  %2259 = vrcp.f32 %v809_v61  ;;  %v2667_v11 = vadd.f32 %v539_v7, %v2435_v26  ;;  %v541_v13 = vpop.f32.mrb[49].mxu0  ;;  %v994_v55 = vmul.f32 %v2238_v3, %v2589_v59 }
 0x146   : > { %v2242_v15 = vpop.eup %2241  ;;  %2261 = vrcp.f32 %v810_v4  ;;  %v543_v34 = vpop.f32.mrb[50].mxu0  ;;  %v2673_v6 = vadd.f32 %v541_v13, %v2437_v27  ;;  %v995_v24 = vmul.f32 %v2240_v8, %v2593_v62 }
 0x147   : > { %v2244_v63 = vpop.eup %2243  ;;  %v996_v16 = vmul.f32 %v2242_v15, %v2597_v9  ;;  %2263 = vpow2.f32 %v1884_v1  ;;  %v1887_v17 = vmul.f32 -1.442695, %v2667_v11  ;;  %v545_v21 = vpop.f32.mrb[51].mxu0  ;;  %v2678_v59 = vadd.f32 %v543_v34, %v2435_v26 }
 0x148   : > { %v2246_v23 = vpop.eup %2245  ;;  %v997_v43 = vmul.f32 %v2244_v63, %v2600_v10  ;;  %2265 = vpow2.f32 %v1885_v51  ;;  %v2681_v9 = vadd.f32 %v545_v21, %v2437_v27  ;;  %v1888_v10 = vmul.f32 -1.442695, %v2673_v6 }
 0x149   : > { %v2248_v25 = vpop.eup %2247  ;;  %v1092_v58 = vpack.c.bf16 %v996_v16, %v994_v55  ;;  %v811_v49 = vadd.f32 1.0, %v2246_v23  ;;  %2267 = vpow2.f32 %v1886_v0  ;;  %v1889_v32 = vmul.f32 -1.442695, %v2678_v59 }
 0x14a   : > { %v2250_v33 = vpop.eup %2249  ;;  %v812_v22 = vadd.f32 1.0, %v2248_v25  ;;  %2269 = vpow2.f32 %v1887_v17  ;;  %v1093_v35 = vpack.c.bf16 %v997_v43, %v995_v24  ;;  %v1890_v18 = vmul.f32 -1.442695, %v2681_v9 }
 0x14b   : > { %v2252_v40 = vpop.eup %2251  ;;  %2271 = vrcp.f32 %v811_v49  ;;  %v813_v62 = vadd.f32 1.0, %v2250_v33 }
 0x14c   : > { %v2254_v45 = vpop.eup %2253  ;;  %2273 = vrcp.f32 %v812_v22  ;;  %v814_v20 = vadd.f32 1.0, %v2252_v40  ;;  %1374 = vmatprep.subr.bf16.mxu0 %v1093_v35  ;;  %1964 = vmatprep.subr.bf16.mxu1 %v1093_v35  ;;  %v549_v47 = vpop.f32.mrb[52].mxu0 }
 0x14d   : > { %v2256_v48 = vpop.eup %2255  ;;  %2275 = vrcp.f32 %v813_v62  ;;  %1375 = vmatpush1.bf16.msra.mxu0 %v1092_v58  ;;  %1980 = vmatpush1.bf16.msra.mxu1 %v1092_v58  ;;  %v2690_v38 = vadd.f32 %v549_v47, %v2435_v26  ;;  %v551_v29 = vpop.f32.mrb[53].mxu0  ;;  %v998_v54 = vmul.f32 %v2254_v45, %v2609_v14 }
 0x14e   : > { %v2258_v46 = vpop.eup %2257  ;;  %2277 = vrcp.f32 %v814_v20  ;;  %v2694_v31 = vadd.f32 %v551_v29, %v2437_v27  ;;  %v553_v30 = vpop.f32.mrb[54].mxu0  ;;  %v999_v44 = vmul.f32 %v2256_v48, %v2613_v36 }
 0x14f   : > { %v2260_v28 = vpop.eup %2259  ;;  %v1000_v56 = vmul.f32 %v2258_v46, %v2618_v50  ;;  %2279 = vpow2.f32 %v1888_v10  ;;  %v1891_v2 = vmul.f32 -1.442695, %v2690_v38  ;;  %v555_v60 = vpop.f32.mrb[55].mxu0  ;;  %v2702_v3 = vadd.f32 %v553_v30, %v2435_v26 }
 0x150   : > { %v2262_v61 = vpop.eup %2261  ;;  %v1001_v1 = vmul.f32 %v2260_v28, %v2621_v53  ;;  %2281 = vpow2.f32 %v1889_v32  ;;  %v1892_v14 = vmul.f32 -1.442695, %v2694_v31  ;;  %v2705_v36 = vadd.f32 %v555_v60, %v2437_v27 }
 0x151   : > { %v2264_v4 = vpop.eup %2263  ;;  %v1094_v51 = vpack.c.bf16 %v1000_v56, %v998_v54  ;;  %2283 = vpow2.f32 %v1890_v18  ;;  %v1893_v55 = vmul.f32 -1.442695, %v2702_v3  ;;  %v1002_v49 = vmul.f32 %v2262_v61, %v2627_v5 }
 0x152   : > { %v2266_v50 = vpop.eup %2265  ;;  %v815_v7 = vadd.f32 1.0, %v2264_v4  ;;  %2285 = vpow2.f32 %v1891_v2  ;;  %v1095_v8 = vpack.c.bf16 %v1001_v1, %v999_v44  ;;  %v1894_v17 = vmul.f32 -1.442695, %v2705_v36 }
 0x153   : > { %v2268_v0 = vpop.eup %2267  ;;  %v816_v13 = vadd.f32 1.0, %v2266_v50  ;;  %2287 = vpow2.f32 %v1892_v14 }
 0x154   : > { %v2270_v53 = vpop.eup %2269  ;;  %2289 = vrcp.f32 %v815_v7  ;;  %v817_v15 = vadd.f32 1.0, %v2268_v0  ;;  %1376 = vmatprep.subr.bf16.mxu0 %v1095_v8  ;;  %1965 = vmatprep.subr.bf16.mxu1 %v1095_v8  ;;  %v559_v34 = vpop.f32.mrb[56].mxu0 }
 0x155   : > { %v2272_v63 = vpop.eup %2271  ;;  %2291 = vrcp.f32 %v816_v13  ;;  %v818_v16 = vadd.f32 1.0, %v2270_v53  ;;  %1377 = vmatpush1.bf16.msra.mxu0 %v1094_v51  ;;  %1981 = vmatpush1.bf16.msra.mxu1 %v1094_v51  ;;  %v2710_v21 = vadd.f32 %v559_v34, %v2435_v26  ;;  %v561_v23 = vpop.f32.mrb[57].mxu0 }
 0x156   : > { %v2274_v24 = vpop.eup %2273  ;;  %2293 = vrcp.f32 %v817_v15  ;;  %v2713_v43 = vadd.f32 %v561_v23, %v2437_v27  ;;  %v563_v25 = vpop.f32.mrb[58].mxu0  ;;  %v1003_v62 = vmul.f32 %v2272_v63, %v2632_v57 }
 0x157   : > { %v2276_v58 = vpop.eup %2275  ;;  %v1004_v33 = vmul.f32 %v2274_v24, %v2637_v12  ;;  %2295 = vrcp.f32 %v818_v16  ;;  %v1895_v22 = vmul.f32 -1.442695, %v2710_v21  ;;  %v565_v35 = vpop.f32.mrb[59].mxu0  ;;  %v2722_v32 = vadd.f32 %v563_v25, %v2435_v26 }
 0x158   : > { %v2278_v40 = vpop.eup %2277  ;;  %v1005_v10 = vmul.f32 %v2276_v58, %v2641_v19  ;;  %2297 = vpow2.f32 %v1893_v55  ;;  %v1896_v42 = vmul.f32 -1.442695, %v2713_v43  ;;  %v2725_v47 = vadd.f32 %v565_v35, %v2437_v27 }
 0x159   : > { %v2280_v45 = vpop.eup %2279  ;;  %v1096_v20 = vpack.c.bf16 %v1004_v33, %v1002_v49  ;;  %2299 = vpow2.f32 %v1894_v17  ;;  %v1897_v28 = vmul.f32 -1.442695, %v2722_v32  ;;  %v1006_v8 = vmul.f32 %v2278_v40, %v2647_v39 }
 0x15a   : > { %v2282_v5 = vpop.eup %2281  ;;  %v819_v12 = vadd.f32 1.0, %v2280_v45  ;;  %2301 = vpow2.f32 %v1895_v22  ;;  %v1097_v48 = vpack.c.bf16 %v1005_v10, %v1003_v62  ;;  %v1898_v61 = vmul.f32 -1.442695, %v2725_v47 }
 0x15b   : > { %v2284_v18 = vpop.eup %2283  ;;  %v820_v57 = vadd.f32 1.0, %v2282_v5  ;;  %2303 = vpow2.f32 %v1896_v42 }
 0x15c   : > { %v2286_v19 = vpop.eup %2285  ;;  %2305 = vrcp.f32 %v819_v12  ;;  %v821_v29 = vadd.f32 1.0, %v2284_v18  ;;  %1378 = vmatprep.subr.bf16.mxu0 %v1097_v48  ;;  %1966 = vmatprep.subr.bf16.mxu1 %v1097_v48  ;;  %v569_v46 = vpop.f32.mrb[60].mxu0 }
 0x15d   : > { %v2288_v54 = vpop.eup %2287  ;;  %2307 = vrcp.f32 %v820_v57  ;;  %v822_v30 = vadd.f32 1.0, %v2286_v19  ;;  %1379 = vmatpush1.bf16.msra.mxu0 %v1096_v20  ;;  %1982 = vmatpush1.bf16.msra.mxu1 %v1096_v20  ;;  %v2729_v44 = vadd.f32 %v569_v46, %v2435_v26  ;;  %v571_v56 = vpop.f32.mrb[61].mxu0 }
 0x15e   : > { %v2290_v2 = vpop.eup %2289  ;;  %2309 = vrcp.f32 %v821_v29  ;;  %v823_v60 = vadd.f32 1.0, %v2288_v54  ;;  %v2733_v1 = vadd.f32 %v571_v56, %v2437_v27  ;;  %v573_v14 = vpop.f32.mrb[62].mxu0 }
 0x15f   : > { %v2292_v4 = vpop.eup %2291  ;;  %2311 = vrcp.f32 %v822_v30  ;;  %v1899_v51 = vmul.f32 -1.442695, %v2729_v44  ;;  %v575_v50 = vpop.f32.mrb[63].mxu0  ;;  %v1007_v15 = vmul.f32 %v2290_v2, %v2655_v52  ;;  %v2742_v34 = vadd.f32 %v573_v14, %v2435_v26 }
 0x160   : > { %v2294_v7 = vpop.eup %2293  ;;  %v1008_v0 = vmul.f32 %v2292_v4, %v2658_v41  ;;  %2313 = vrcp.f32 %v823_v60  ;;  %v1900_v13 = vmul.f32 -1.442695, %v2733_v1  ;;  %v2745_v17 = vadd.f32 %v575_v50, %v2437_v27 }
 0x161   : > { %v2296_v53 = vpop.eup %2295  ;;  %v1009_v55 = vmul.f32 %v2294_v7, %v2661_v37  ;;  %2315 = vpow2.f32 %v1897_v28  ;;  %v1901_v37 = vmul.f32 -1.442695, %v2742_v34 }
 0x162   : > { %v2298_v63 = vpop.eup %2297  ;;  %v1098_v16 = vpack.c.bf16 %v1008_v0, %v1006_v8  ;;  %2317 = vpow2.f32 %v1898_v61  ;;  %v1902_v58 = vmul.f32 -1.442695, %v2745_v17  ;;  %v1010_v33 = vmul.f32 %v2296_v53, %v2667_v11 }
 0x163   : > { %v2300_v39 = vpop.eup %2299  ;;  %v824_v41 = vadd.f32 1.0, %v2298_v63  ;;  %2319 = vpow2.f32 %v1899_v51  ;;  %v1099_v23 = vpack.c.bf16 %v1009_v55, %v1007_v15 }
 0x164   : > { %v2302_v24 = vpop.eup %2301  ;;  %v825_v25 = vadd.f32 1.0, %v2300_v39  ;;  %2321 = vpow2.f32 %v1900_v13 }
 0x165   : > { %v2304_v52 = vpop.eup %2303  ;;  %2323 = vrcp.f32 %v824_v41  ;;  %1380 = vmatprep.subr.bf16.mxu0 %v1099_v23  ;;  %1967 = vmatprep.subr.bf16.mxu1 %v1099_v23  ;;  %v826_v35 = vadd.f32 1.0, %v2302_v24  ;;  %v2016_v41 = vld [vmem:[%s3021_s3 + $0x80] ss:$8 sps:$4 sm:$0xff]   ;;  %v2022_v24 = vld [vmem:[%s3021_s3 + $0xa4] ss:$8 sps:$4 sm:$0xff]  }
 0x166   : > { %v2306_v26 = vpop.eup %2305  ;;  %2325 = vrcp.f32 %v825_v25  ;;  %1381 = vmatpush1.bf16.msra.mxu0 %v1098_v16  ;;  %1983 = vmatpush1.bf16.msra.mxu1 %v1098_v16  ;;  %v827_v42 = vadd.f32 1.0, %v2304_v52  ;;  %v2043_v23 = vld [vmem:[%s3021_s3] ss:$8 sps:$4 sm:$0xff]   ;;  %v2055_v25 = vld [vmem:[%s3021_s3 + $0x24] ss:$8 sps:$4 sm:$0xff]  }
 0x167   : > { %v2308_v27 = vpop.eup %2307  ;;  %v1011_v62 = vmul.f32 %v2306_v26, %v2673_v6  ;;  %2327 = vpow2.f32 %v1901_v37  ;;  %v2024_v52 = vld [vmem:[%s3021_s3 + $0xa0] ss:$8 sps:$4 sm:$0xff]   ;;  %v2025_v26 = vld [vmem:[%s3021_s3 + $0xb4] ss:$8 sps:$4 sm:$0xff]  }
 0x168   : > { %v2310_v49 = vpop.eup %2309  ;;  %v1012_v22 = vmul.f32 %v2308_v27, %v2678_v59  ;;  %2329 = vpow2.f32 %v1902_v58  ;;  %v2057_v37 = vld [vmem:[%s3021_s3 + $0x20] ss:$8 sps:$4 sm:$0xff]   ;;  %v2061_v58 = vld [vmem:[%s3021_s3 + $0x34] ss:$8 sps:$4 sm:$0xff]   ;;  %v2027_v27 = vld [vmem:[%s3021_s3 + $0xb0] ss:$8 sps:$4 sm:$0xff]  }
 0x169   : > { %v2312_v40 = vpop.eup %2311  ;;  %v1013_v10 = vmul.f32 %v2310_v49, %v2681_v9  ;;  %2331 = vrcp.f32 %v826_v35  ;;  %v2063_v49 = vld [vmem:[%s3021_s3 + $0x30] ss:$8 sps:$4 sm:$0xff]   ;;  %v2030_v35 = vld [vmem:[%s3021_s3 + $0xc0] ss:$8 sps:$4 sm:$0xff]  }
 0x16a   : > { %v2314_v45 = vpop.eup %2313  ;;  %v1100_v20 = vpack.c.bf16 %v1012_v22, %v1010_v33  ;;  %2333 = vrcp.f32 %v827_v42  ;;  %v1014_v19 = vmul.f32 %v2312_v40, %v2690_v38  ;;  %v2028_v33 = vld [vmem:[%s3021_s3 + $0xc4] ss:$8 sps:$4 sm:$0xff]   ;;  %v2069_v40 = vld [vmem:[%s3021_s3 + $0x40] ss:$8 sps:$4 sm:$0xff]   ;;  %v2033_v42 = vld [vmem:[%s3021_s3 + $0xd0] ss:$8 sps:$4 sm:$0xff]  }
 0x16b   : > { %v2316_v5 = vpop.eup %2315  ;;  %v1101_v12 = vpack.c.bf16 %v1013_v10, %v1011_v62  ;;  %v1015_v54 = vmul.f32 %v2314_v45, %v2694_v31  ;;  %v2067_v22 = vld [vmem:[%s3021_s3 + $0x44] ss:$8 sps:$4 sm:$0xff]   ;;  %v2031_v62 = vld [vmem:[%s3021_s3 + $0xd4] ss:$8 sps:$4 sm:$0xff]   ;;  %v2075_v45 = vld [vmem:[%s3021_s3 + $0x50] ss:$8 sps:$4 sm:$0xff]  }
 0x16c   : > { %v2318_v48 = vpop.eup %2317  ;;  %v828_v18 = vadd.f32 1.0, %v2316_v5  ;;  %v2073_v10 = vld [vmem:[%s3021_s3 + $0x54] ss:$8 sps:$4 sm:$0xff]   ;;  %v2079_v5 = vld [vmem:[%s3021_s3 + $0x64] ss:$8 sps:$4 sm:$0xff]  }
 0x16d   : > { %v2320_v57 = vpop.eup %2319  ;;  %v829_v11 = vadd.f32 1.0, %v2318_v48  ;;  %1382 = vmatprep.subr.bf16.mxu0 %v1101_v12  ;;  %1968 = vmatprep.subr.bf16.mxu1 %v1101_v12  ;;  %v2036_v12 = vld [vmem:[%s3021_s3 + $0xe0] ss:$8 sps:$4 sm:$0xff]  }
 0x16e   : > { %v2322_v59 = vpop.eup %2321  ;;  %2335 = vrcp.f32 %v828_v18  ;;  %1383 = vmatpush1.bf16.msra.mxu0 %v1100_v20  ;;  %1984 = vmatpush1.bf16.msra.mxu1 %v1100_v20  ;;  %v830_v46 = vadd.f32 1.0, %v2320_v57  ;;  %v2034_v20 = vld [vmem:[%s3021_s3 + $0xe4] ss:$8 sps:$4 sm:$0xff]   ;;  %v2081_v48 = vld [vmem:[%s3021_s3 + $0x60] ss:$8 sps:$4 sm:$0xff]  }
 0x16f   : > { %v2324_v6 = vpop.eup %2323  ;;  %2337 = vrcp.f32 %v829_v11  ;;  %v831_v28 = vadd.f32 1.0, %v2322_v59  ;;  %v2037_v18 = vld [vmem:[%s3021_s3 + $0xf4] ss:$8 sps:$4 sm:$0xff]   ;;  %v2039_v11 = vld [vmem:[%s3021_s3 + $0xf0] ss:$8 sps:$4 sm:$0xff]  }
 0x170   : > { %v2326_v9 = vpop.eup %2325  ;;  %v1016_v29 = vmul.f32 %v2324_v6, %v2702_v3  ;;  %2339 = vrcp.f32 %v830_v46  ;;  %v2085_v57 = vld [vmem:[%s3021_s3 + $0x74] ss:$8 sps:$4 sm:$0xff]   ;;  %v2087_v59 = vld [vmem:[%s3021_s3 + $0x70] ss:$8 sps:$4 sm:$0xff]   ;;  %v2040_v6 = vld [vmem:[%s3021_s3 + $0x104] ss:$8 sps:$4 sm:$0xff]  }
 0x171   : > { %v1017_v30 = vmul.f32 %v2326_v9, %v2705_v36  ;;  %v2328_v2 = vpop.eup %2327  ;;  %2341 = vrcp.f32 %v831_v28  ;;  %v2042_v9 = vld [vmem:[%s3021_s3 + $0x100] ss:$8 sps:$4 sm:$0xff]   ;;  %v2052_v46 = vld [vmem:[%s3021_s3 + $0x124] ss:$8 sps:$4 sm:$0xff]   ;;  %v2060_v28 = vld [vmem:[%s3021_s3 + $0x130] ss:$8 sps:$4 sm:$0xff]  }
 0x172   : > { %v1102_v56 = vpack.c.bf16 %v1016_v29, %v1014_v19  ;;  %v2330_v61 = vpop.eup %2329  ;;  %v832_v14 = vadd.f32 1.0, %v2328_v2  ;;  %v2046_v19 = vld [vmem:[%s3021_s3 + $0x114] ss:$8 sps:$4 sm:$0xff]   ;;  %v2048_v29 = vld [vmem:[%s3021_s3 + $0x110] ss:$8 sps:$4 sm:$0xff]  }
 0x173   : > { %v1103_v60 = vpack.c.bf16 %v1017_v30, %v1015_v54  ;;  %v833_v4 = vadd.f32 1.0, %v2330_v61  ;;  %v2332_v51 = vpop.eup %2331  ;;  %v2054_v54 = vld [vmem:[%s3021_s3 + $0x120] ss:$8 sps:$4 sm:$0xff]   ;;  %v2058_v30 = vld [vmem:[%s3021_s3 + $0x134] ss:$8 sps:$4 sm:$0xff]  }
 0x174   : > { %2343 = vrcp.f32 %v832_v14  ;;  %v2334_v38 = vpop.eup %2333  ;;  %v1018_v36 = vmul.f32 %v2332_v51, %v2710_v21  ;;  %v2066_v2 = vld [vmem:[%s3021_s3 + $0x140] ss:$8 sps:$4 sm:$0xff]   ;;  %v2072_v61 = vld [vmem:[%s3021_s3 + $0x150] ss:$8 sps:$4 sm:$0xff]   ;;  %v2076_v14 = vld [vmem:[%s3021_s3 + $0x164] ss:$8 sps:$4 sm:$0xff]  }
 0x175   : > { %1384 = vmatprep.subr.bf16.mxu0 %v1103_v60  ;;  %1969 = vmatprep.subr.bf16.mxu1 %v1103_v60  ;;  %2345 = vrcp.f32 %v833_v4  ;;  %v1019_v7 = vmul.f32 %v2334_v38, %v2713_v43  ;;  %v2070_v60 = vld [vmem:[%s3021_s3 + $0x154] ss:$8 sps:$4 sm:$0xff]   ;;  %v2078_v4 = vld [vmem:[%s3021_s3 + $0x160] ss:$8 sps:$4 sm:$0xff]   ;;  %v2084_v38 = vld [vmem:[%s3021_s3 + $0x170] ss:$8 sps:$4 sm:$0xff]  }
 0x176   : > { %1385 = vmatpush1.bf16.msra.mxu0 %v1102_v56  ;;  %1985 = vmatpush1.bf16.msra.mxu1 %v1102_v56  ;;  %v2064_v56 = vld [vmem:[%s3021_s3 + $0x144] ss:$8 sps:$4 sm:$0xff]   ;;  %v2082_v51 = vld [vmem:[%s3021_s3 + $0x174] ss:$8 sps:$4 sm:$0xff]  }
 0x178   : > { %v2336_v31 = vpop.eup %2335 }
 0x179   : > { %v2338_v3 = vpop.eup %2337  ;;  %v1020_v50 = vmul.f32 %v2336_v31, %v2722_v32  ;;  %v2088_v31 = vld [vmem:[%s3021_s3 + $0x184] ss:$8 sps:$4 sm:$0xff]  }
 0x17a   : > { %v1021_v8 = vmul.f32 %v2338_v3, %v2725_v47  ;;  %v2340_v53 = vpop.eup %2339  ;;  %v2090_v3 = vld [vmem:[%s3021_s3 + $0x180] ss:$8 sps:$4 sm:$0xff]  }
 0x17b   : > { %v1104_v0 = vpack.c.bf16 %v1020_v50, %v1018_v36  ;;  %v2342_v15 = vpop.eup %2341  ;;  %v1022_v16 = vmul.f32 %v2340_v53, %v2729_v44  ;;  %v2019_v44 = vld [vmem:[%s3021_s3 + $0x94] ss:$8 sps:$4 sm:$0xff]  }
 0x17c   : > { %v1105_v13 = vpack.c.bf16 %v1021_v8, %v1019_v7  ;;  %v1023_v32 = vmul.f32 %v2342_v15, %v2733_v1  ;;  %v2049_v1 = vld [vmem:[%s3021_s3 + $0x14] ss:$8 sps:$4 sm:$0xff]  }
 0x17e   : > { %1386 = vmatprep.subr.bf16.mxu0 %v1105_v13  ;;  %1970 = vmatprep.subr.bf16.mxu1 %v1105_v13  ;;  %v2344_v55 = vpop.eup %2343 }
 0x17f   : > { %1387 = vmatpush1.bf16.msra.mxu0 %v1104_v0  ;;  %1986 = vmatpush1.bf16.msra.mxu1 %v1104_v0  ;;  %v2346_v63 = vpop.eup %2345  ;;  %v1024_v21 = vmul.f32 %v2344_v55, %v2742_v34  ;;  %v2021_v34 = vld [vmem:[%s3021_s3 + $0x90] ss:$8 sps:$4 sm:$0xff]  }
 0x180   : > { %v1025_v43 = vmul.f32 %v2346_v63, %v2745_v17  ;;  %v2051_v17 = vld [vmem:[%s3021_s3 + $0x10] ss:$8 sps:$4 sm:$0xff]  }
 0x181   : > { %v1106_v39 = vpack.c.bf16 %v1024_v21, %v1022_v16 }
 0x182   : > { %v1107_v47 = vpack.c.bf16 %v1025_v43, %v1023_v32 }
 0x184   : > { %1388 = vmatprep.subr.bf16.mxu0 %v1107_v47  ;;  %1971 = vmatprep.subr.bf16.mxu1 %v1107_v47 }
 0x185   : > { %1389 = vmatpush1.bf16.msra.mxu0 %v1106_v39  ;;  %1987 = vmatpush1.bf16.msra.mxu1 %v1106_v39 }
 0x188   : > { %1471 = vmatmul.mubr.bf16.vlgmr.msra.gmra.mrb[0].mxu1 %v2016_v41  ;;  %1391 = vmatmul.mubr.bf16.vlgmr.msra.gmra.mrb[64].mxu0 %v2043_v23 }
 0x189   : > { %1480 = vmatprep.mubr.bf16.mxu1 %v2019_v44  ;;  %1400 = vmatprep.mubr.bf16.mxu0 %v2049_v1 }
 0x190   : > { %1481 = vmatmul.mubr.bf16.gmra.mrb[4].mxu1 %v2021_v34  ;;  %1401 = vmatmul.mubr.bf16.gmra.mrb[68].mxu0 %v2051_v17 }
 0x191   : > { %1490 = vmatprep.mubr.bf16.mxu1 %v2022_v24  ;;  %1410 = vmatprep.mubr.bf16.mxu0 %v2055_v25 }
 0x198   : > { %1491 = vmatmul.mubr.bf16.gmra.mrb[8].mxu1 %v2024_v52  ;;  %1411 = vmatmul.mubr.bf16.gmra.mrb[72].mxu0 %v2057_v37 }
 0x199   : > { %1500 = vmatprep.mubr.bf16.mxu1 %v2025_v26  ;;  %1420 = vmatprep.mubr.bf16.mxu0 %v2061_v58 }
 0x1a0   : > { %1501 = vmatmul.mubr.bf16.gmra.mrb[12].mxu1 %v2027_v27  ;;  %1421 = vmatmul.mubr.bf16.gmra.mrb[76].mxu0 %v2063_v49 }
 0x1a1   : > { %1510 = vmatprep.mubr.bf16.mxu1 %v2028_v33  ;;  %1430 = vmatprep.mubr.bf16.mxu0 %v2067_v22 }
 0x1a8   : > { %1511 = vmatmul.mubr.bf16.gmra.mrb[16].mxu1 %v2030_v35  ;;  %1431 = vmatmul.mubr.bf16.gmra.mrb[80].mxu0 %v2069_v40 }
 0x1a9   : > { %1520 = vmatprep.mubr.bf16.mxu1 %v2031_v62  ;;  %1440 = vmatprep.mubr.bf16.mxu0 %v2073_v10 }
 0x1b0   : > { %1521 = vmatmul.mubr.bf16.gmra.mrb[20].mxu1 %v2033_v42  ;;  %1441 = vmatmul.mubr.bf16.gmra.mrb[84].mxu0 %v2075_v45 }
 0x1b1   : > { %1530 = vmatprep.mubr.bf16.mxu1 %v2034_v20  ;;  %1450 = vmatprep.mubr.bf16.mxu0 %v2079_v5 }
 0x1b8   : > { %1531 = vmatmul.mubr.bf16.gmra.mrb[24].mxu1 %v2036_v12  ;;  %1451 = vmatmul.mubr.bf16.gmra.mrb[88].mxu0 %v2081_v48 }
 0x1b9   : > { %1540 = vmatprep.mubr.bf16.mxu1 %v2037_v18  ;;  %1460 = vmatprep.mubr.bf16.mxu0 %v2085_v57 }
 0x1c0   : > { %1541 = vmatmul.mubr.bf16.gmra.mrb[28].mxu1 %v2039_v11  ;;  %1461 = vmatmul.mubr.bf16.gmra.mrb[92].mxu0 %v2087_v59 }
 0x1c1   : > { %1550 = vmatprep.mubr.bf16.mxu1 %v2040_v6 }
 0x1c8   : > { %1551 = vmatmul.mubr.bf16.gmra.mrb[32].mxu1 %v2042_v9 }
 0x1c9   : > { %1560 = vmatprep.mubr.bf16.mxu1 %v2046_v19 }
 0x1d0   : > { %1561 = vmatmul.mubr.bf16.gmra.mrb[36].mxu1 %v2048_v29 }
 0x1d1   : > { %1570 = vmatprep.mubr.bf16.mxu1 %v2052_v46 }
 0x1d8   : > { %1571 = vmatmul.mubr.bf16.gmra.mrb[40].mxu1 %v2054_v54 }
 0x1d9   : > { %1580 = vmatprep.mubr.bf16.mxu1 %v2058_v30 }
 0x1e0   : > { %1581 = vmatmul.mubr.bf16.gmra.mrb[44].mxu1 %v2060_v28 }
 0x1e1   : > { %1590 = vmatprep.mubr.bf16.mxu1 %v2064_v56 }
 0x1e8   : > { %1591 = vmatmul.mubr.bf16.gmra.mrb[48].mxu1 %v2066_v2 }
 0x1e9   : > { %1600 = vmatprep.mubr.bf16.mxu1 %v2070_v60 }
 0x1f0   : > { %1601 = vmatmul.mubr.bf16.gmra.mrb[52].mxu1 %v2072_v61 }
 0x1f1   : > { %1610 = vmatprep.mubr.bf16.mxu1 %v2076_v14 }
 0x1f8   : > { %1611 = vmatmul.mubr.bf16.gmra.mrb[56].mxu1 %v2078_v4 }
 0x1f9   : > { %1620 = vmatprep.mubr.bf16.mxu1 %v2082_v51 }
 0x200   : > { %1621 = vmatmul.mubr.bf16.gmra.mrb[60].mxu1 %v2084_v38 }
 0x201   : > { %1630 = vmatprep.mubr.bf16.mxu1 %v2088_v31 }
 0x208   : > { %1631 = vmatmul.mubr.bf16.gmra.mrb[64].mxu1 %v2090_v3 }
 0x25b   : > { %v1472_v36 = vpop.f32.mrb[0].mxu1  ;;  %v1392_v50 = vpop.f32.mrb[64].mxu0 }
 0x25c   : > { %1673 = vst [vmem:[%s2913_s6 + $0x100] sm:$0xff] %v1472_v36  ;;  %v1474_v7 = vpop.f32.mrb[1].mxu1  ;;  %1641 = vst [vmem:[%s2913_s6] sm:$0xff] %v1392_v50  ;;  %v1394_v8 = vpop.f32.mrb[65].mxu0 }
 0x25d   : > { %1674 = vst [vmem:[%s2913_s6 + $0x108] sm:$0xff] %v1474_v7  ;;  %v1476_v0 = vpop.f32.mrb[2].mxu1  ;;  %1642 = vst [vmem:[%s2913_s6 + $0x8] sm:$0xff] %v1394_v8  ;;  %v1396_v13 = vpop.f32.mrb[66].mxu0 }
 0x25e   : > { %1675 = vst [vmem:[%s2913_s6 + $0x110] sm:$0xff] %v1476_v0  ;;  %v1478_v53 = vpop.f32.mrb[3].mxu1  ;;  %1643 = vst [vmem:[%s2913_s6 + $0x10] sm:$0xff] %v1396_v13  ;;  %v1398_v15 = vpop.f32.mrb[67].mxu0 }
 0x25f   : > { %1676 = vst [vmem:[%s2913_s6 + $0x118] sm:$0xff] %v1478_v53  ;;  %1644 = vst [vmem:[%s2913_s6 + $0x18] sm:$0xff] %v1398_v15 }
 0x263   : > { %v1482_v55 = vpop.f32.mrb[4].mxu1  ;;  %v1402_v63 = vpop.f32.mrb[68].mxu0 }
 0x264   : > { %1677 = vst [vmem:[%s2913_s6 + $0x120] sm:$0xff] %v1482_v55  ;;  %v1484_v16 = vpop.f32.mrb[5].mxu1  ;;  %1645 = vst [vmem:[%s2913_s6 + $0x20] sm:$0xff] %v1402_v63  ;;  %v1404_v21 = vpop.f32.mrb[69].mxu0 }
 0x265   : > { %1678 = vst [vmem:[%s2913_s6 + $0x128] sm:$0xff] %v1484_v16  ;;  %v1486_v32 = vpop.f32.mrb[6].mxu1  ;;  %1646 = vst [vmem:[%s2913_s6 + $0x28] sm:$0xff] %v1404_v21  ;;  %v1406_v43 = vpop.f32.mrb[70].mxu0 }
 0x266   : > { %1679 = vst [vmem:[%s2913_s6 + $0x130] sm:$0xff] %v1486_v32  ;;  %v1488_v39 = vpop.f32.mrb[7].mxu1  ;;  %1647 = vst [vmem:[%s2913_s6 + $0x30] sm:$0xff] %v1406_v43  ;;  %v1408_v47 = vpop.f32.mrb[71].mxu0 }
 0x267   : > { %1680 = vst [vmem:[%s2913_s6 + $0x138] sm:$0xff] %v1488_v39  ;;  %1648 = vst [vmem:[%s2913_s6 + $0x38] sm:$0xff] %v1408_v47 }
 0x26b   : > { %v1492_v41 = vpop.f32.mrb[8].mxu1  ;;  %v1412_v23 = vpop.f32.mrb[72].mxu0 }
 0x26c   : > { %1681 = vst [vmem:[%s2913_s6 + $0x140] sm:$0xff] %v1492_v41  ;;  %v1494_v44 = vpop.f32.mrb[9].mxu1  ;;  %1649 = vst [vmem:[%s2913_s6 + $0x40] sm:$0xff] %v1412_v23  ;;  %v1414_v1 = vpop.f32.mrb[73].mxu0 }
 0x26d   : > { %1682 = vst [vmem:[%s2913_s6 + $0x148] sm:$0xff] %v1494_v44  ;;  %v1496_v34 = vpop.f32.mrb[10].mxu1  ;;  %1650 = vst [vmem:[%s2913_s6 + $0x48] sm:$0xff] %v1414_v1  ;;  %v1416_v17 = vpop.f32.mrb[74].mxu0 }
 0x26e   : > { %1683 = vst [vmem:[%s2913_s6 + $0x150] sm:$0xff] %v1496_v34  ;;  %v1498_v24 = vpop.f32.mrb[11].mxu1  ;;  %1651 = vst [vmem:[%s2913_s6 + $0x50] sm:$0xff] %v1416_v17  ;;  %v1418_v25 = vpop.f32.mrb[75].mxu0 }
 0x26f   : > { %1684 = vst [vmem:[%s2913_s6 + $0x158] sm:$0xff] %v1498_v24  ;;  %1652 = vst [vmem:[%s2913_s6 + $0x58] sm:$0xff] %v1418_v25 }
 0x273   : > { %v1502_v52 = vpop.f32.mrb[12].mxu1  ;;  %v1422_v37 = vpop.f32.mrb[76].mxu0 }
 0x274   : > { %1685 = vst [vmem:[%s2913_s6 + $0x160] sm:$0xff] %v1502_v52  ;;  %v1504_v26 = vpop.f32.mrb[13].mxu1  ;;  %1653 = vst [vmem:[%s2913_s6 + $0x60] sm:$0xff] %v1422_v37  ;;  %v1424_v58 = vpop.f32.mrb[77].mxu0 }
 0x275   : > { %1686 = vst [vmem:[%s2913_s6 + $0x168] sm:$0xff] %v1504_v26  ;;  %v1506_v27 = vpop.f32.mrb[14].mxu1  ;;  %1654 = vst [vmem:[%s2913_s6 + $0x68] sm:$0xff] %v1424_v58  ;;  %v1426_v49 = vpop.f32.mrb[78].mxu0 }
 0x276   : > { %1687 = vst [vmem:[%s2913_s6 + $0x170] sm:$0xff] %v1506_v27  ;;  %v1508_v33 = vpop.f32.mrb[15].mxu1  ;;  %1655 = vst [vmem:[%s2913_s6 + $0x70] sm:$0xff] %v1426_v49  ;;  %v1428_v22 = vpop.f32.mrb[79].mxu0 }
 0x277   : > { %1688 = vst [vmem:[%s2913_s6 + $0x178] sm:$0xff] %v1508_v33  ;;  %1656 = vst [vmem:[%s2913_s6 + $0x78] sm:$0xff] %v1428_v22 }
 0x27b   : > { %v1512_v35 = vpop.f32.mrb[16].mxu1  ;;  %v1432_v40 = vpop.f32.mrb[80].mxu0 }
 0x27c   : > { %1689 = vst [vmem:[%s2913_s6 + $0x180] sm:$0xff] %v1512_v35  ;;  %v1514_v62 = vpop.f32.mrb[17].mxu1  ;;  %1657 = vst [vmem:[%s2913_s6 + $0x80] sm:$0xff] %v1432_v40  ;;  %v1434_v10 = vpop.f32.mrb[81].mxu0 }
 0x27d   : > { %1690 = vst [vmem:[%s2913_s6 + $0x188] sm:$0xff] %v1514_v62  ;;  %v1516_v42 = vpop.f32.mrb[18].mxu1  ;;  %1658 = vst [vmem:[%s2913_s6 + $0x88] sm:$0xff] %v1434_v10  ;;  %v1436_v45 = vpop.f32.mrb[82].mxu0 }
 0x27e   : > { %1691 = vst [vmem:[%s2913_s6 + $0x190] sm:$0xff] %v1516_v42  ;;  %v1518_v20 = vpop.f32.mrb[19].mxu1  ;;  %1659 = vst [vmem:[%s2913_s6 + $0x90] sm:$0xff] %v1436_v45  ;;  %v1438_v5 = vpop.f32.mrb[83].mxu0 }
 0x27f   : > { %1692 = vst [vmem:[%s2913_s6 + $0x198] sm:$0xff] %v1518_v20  ;;  %1660 = vst [vmem:[%s2913_s6 + $0x98] sm:$0xff] %v1438_v5 }
 0x283   : > { %v1522_v12 = vpop.f32.mrb[20].mxu1  ;;  %v1442_v48 = vpop.f32.mrb[84].mxu0 }
 0x284   : > { %1693 = vst [vmem:[%s2913_s6 + $0x1a0] sm:$0xff] %v1522_v12  ;;  %v1524_v18 = vpop.f32.mrb[21].mxu1  ;;  %1661 = vst [vmem:[%s2913_s6 + $0xa0] sm:$0xff] %v1442_v48  ;;  %v1444_v57 = vpop.f32.mrb[85].mxu0 }
 0x285   : > { %1694 = vst [vmem:[%s2913_s6 + $0x1a8] sm:$0xff] %v1524_v18  ;;  %v1526_v11 = vpop.f32.mrb[22].mxu1  ;;  %1662 = vst [vmem:[%s2913_s6 + $0xa8] sm:$0xff] %v1444_v57  ;;  %v1446_v59 = vpop.f32.mrb[86].mxu0 }
 0x286   : > { %1695 = vst [vmem:[%s2913_s6 + $0x1b0] sm:$0xff] %v1526_v11  ;;  %v1528_v6 = vpop.f32.mrb[23].mxu1  ;;  %1663 = vst [vmem:[%s2913_s6 + $0xb0] sm:$0xff] %v1446_v59  ;;  %v1448_v9 = vpop.f32.mrb[87].mxu0 }
 0x287   : > { %1696 = vst [vmem:[%s2913_s6 + $0x1b8] sm:$0xff] %v1528_v6  ;;  %1664 = vst [vmem:[%s2913_s6 + $0xb8] sm:$0xff] %v1448_v9 }
 0x28b   : > { %v1532_v19 = vpop.f32.mrb[24].mxu1  ;;  %v1452_v29 = vpop.f32.mrb[88].mxu0 }
 0x28c   : > { %1697 = vst [vmem:[%s2913_s6 + $0x1c0] sm:$0xff] %v1532_v19  ;;  %v1534_v46 = vpop.f32.mrb[25].mxu1  ;;  %1665 = vst [vmem:[%s2913_s6 + $0xc0] sm:$0xff] %v1452_v29  ;;  %v1454_v54 = vpop.f32.mrb[89].mxu0 }
 0x28d   : > { %1698 = vst [vmem:[%s2913_s6 + $0x1c8] sm:$0xff] %v1534_v46  ;;  %v1536_v30 = vpop.f32.mrb[26].mxu1  ;;  %1666 = vst [vmem:[%s2913_s6 + $0xc8] sm:$0xff] %v1454_v54  ;;  %v1456_v28 = vpop.f32.mrb[90].mxu0 }
 0x28e   : > { %1699 = vst [vmem:[%s2913_s6 + $0x1d0] sm:$0xff] %v1536_v30  ;;  %v1538_v56 = vpop.f32.mrb[27].mxu1  ;;  %1667 = vst [vmem:[%s2913_s6 + $0xd0] sm:$0xff] %v1456_v28  ;;  %v1458_v2 = vpop.f32.mrb[91].mxu0 }
 0x28f   : > { %1700 = vst [vmem:[%s2913_s6 + $0x1d8] sm:$0xff] %v1538_v56  ;;  %1668 = vst [vmem:[%s2913_s6 + $0xd8] sm:$0xff] %v1458_v2 }
 0x293   : > { %v1542_v60 = vpop.f32.mrb[28].mxu1  ;;  %v1462_v61 = vpop.f32.mrb[92].mxu0 }
 0x294   : > { %1701 = vst [vmem:[%s2913_s6 + $0x1e0] sm:$0xff] %v1542_v60  ;;  %v1544_v14 = vpop.f32.mrb[29].mxu1  ;;  %1669 = vst [vmem:[%s2913_s6 + $0xe0] sm:$0xff] %v1462_v61  ;;  %v1464_v4 = vpop.f32.mrb[93].mxu0 }
 0x295   : > { %1702 = vst [vmem:[%s2913_s6 + $0x1e8] sm:$0xff] %v1544_v14  ;;  %v1546_v51 = vpop.f32.mrb[30].mxu1  ;;  %1670 = vst [vmem:[%s2913_s6 + $0xe8] sm:$0xff] %v1464_v4  ;;  %v1466_v38 = vpop.f32.mrb[94].mxu0 }
 0x296   : > { %1703 = vst [vmem:[%s2913_s6 + $0x1f0] sm:$0xff] %v1546_v51  ;;  %v1548_v31 = vpop.f32.mrb[31].mxu1  ;;  %1671 = vst [vmem:[%s2913_s6 + $0xf0] sm:$0xff] %v1466_v38  ;;  %v1468_v3 = vpop.f32.mrb[95].mxu0 }
 0x297   : > { %1704 = vst [vmem:[%s2913_s6 + $0x1f8] sm:$0xff] %v1548_v31  ;;  %1672 = vst [vmem:[%s2913_s6 + $0xf8] sm:$0xff] %v1468_v3 }
 0x29b   : > { %v1552_v36 = vpop.f32.mrb[32].mxu1 }
 0x29c   : > { %1705 = vst [vmem:[%s2913_s6 + $0x200] sm:$0xff] %v1552_v36  ;;  %v1554_v50 = vpop.f32.mrb[33].mxu1 }
 0x29d   : > { %1706 = vst [vmem:[%s2913_s6 + $0x208] sm:$0xff] %v1554_v50  ;;  %v1556_v7 = vpop.f32.mrb[34].mxu1 }
 0x29e   : > { %1707 = vst [vmem:[%s2913_s6 + $0x210] sm:$0xff] %v1556_v7  ;;  %v1558_v8 = vpop.f32.mrb[35].mxu1 }
 0x29f   : > { %1708 = vst [vmem:[%s2913_s6 + $0x218] sm:$0xff] %v1558_v8 }
 0x2a3   : > { %v1562_v0 = vpop.f32.mrb[36].mxu1 }
 0x2a4   : > { %1709 = vst [vmem:[%s2913_s6 + $0x220] sm:$0xff] %v1562_v0  ;;  %v1564_v13 = vpop.f32.mrb[37].mxu1 }
 0x2a5   : > { %1710 = vst [vmem:[%s2913_s6 + $0x228] sm:$0xff] %v1564_v13  ;;  %v1566_v53 = vpop.f32.mrb[38].mxu1 }
 0x2a6   : > { %1711 = vst [vmem:[%s2913_s6 + $0x230] sm:$0xff] %v1566_v53  ;;  %v1568_v15 = vpop.f32.mrb[39].mxu1 }
 0x2a7   : > { %1712 = vst [vmem:[%s2913_s6 + $0x238] sm:$0xff] %v1568_v15 }
 0x2ab   : > { %v1572_v55 = vpop.f32.mrb[40].mxu1 }
 0x2ac   : > { %1713 = vst [vmem:[%s2913_s6 + $0x240] sm:$0xff] %v1572_v55  ;;  %v1574_v63 = vpop.f32.mrb[41].mxu1 }
 0x2ad   : > { %1714 = vst [vmem:[%s2913_s6 + $0x248] sm:$0xff] %v1574_v63  ;;  %v1576_v16 = vpop.f32.mrb[42].mxu1 }
 0x2ae   : > { %1715 = vst [vmem:[%s2913_s6 + $0x250] sm:$0xff] %v1576_v16  ;;  %v1578_v21 = vpop.f32.mrb[43].mxu1 }
 0x2af   : > { %1716 = vst [vmem:[%s2913_s6 + $0x258] sm:$0xff] %v1578_v21 }
 0x2b3   : > { %v1582_v32 = vpop.f32.mrb[44].mxu1 }
 0x2b4   : > { %1717 = vst [vmem:[%s2913_s6 + $0x260] sm:$0xff] %v1582_v32  ;;  %v1584_v43 = vpop.f32.mrb[45].mxu1 }
 0x2b5   : > { %1718 = vst [vmem:[%s2913_s6 + $0x268] sm:$0xff] %v1584_v43  ;;  %v1586_v39 = vpop.f32.mrb[46].mxu1 }
 0x2b6   : > { %1719 = vst [vmem:[%s2913_s6 + $0x270] sm:$0xff] %v1586_v39  ;;  %v1588_v47 = vpop.f32.mrb[47].mxu1 }
 0x2b7   : > { %1720 = vst [vmem:[%s2913_s6 + $0x278] sm:$0xff] %v1588_v47 }
 0x2bb   : > { %v1592_v41 = vpop.f32.mrb[48].mxu1 }
 0x2bc   : > { %1721 = vst [vmem:[%s2913_s6 + $0x280] sm:$0xff] %v1592_v41  ;;  %v1594_v23 = vpop.f32.mrb[49].mxu1 }
 0x2bd   : > { %1722 = vst [vmem:[%s2913_s6 + $0x288] sm:$0xff] %v1594_v23  ;;  %v1596_v44 = vpop.f32.mrb[50].mxu1 }
 0x2be   : > { %1723 = vst [vmem:[%s2913_s6 + $0x290] sm:$0xff] %v1596_v44  ;;  %v1598_v1 = vpop.f32.mrb[51].mxu1 }
 0x2bf   : > { %1724 = vst [vmem:[%s2913_s6 + $0x298] sm:$0xff] %v1598_v1 }
 0x2c3   : > { %v1602_v34 = vpop.f32.mrb[52].mxu1 }
 0x2c4   : > { %1725 = vst [vmem:[%s2913_s6 + $0x2a0] sm:$0xff] %v1602_v34  ;;  %v1604_v17 = vpop.f32.mrb[53].mxu1 }
 0x2c5   : > { %1726 = vst [vmem:[%s2913_s6 + $0x2a8] sm:$0xff] %v1604_v17  ;;  %v1606_v24 = vpop.f32.mrb[54].mxu1 }
 0x2c6   : > { %1727 = vst [vmem:[%s2913_s6 + $0x2b0] sm:$0xff] %v1606_v24  ;;  %v1608_v25 = vpop.f32.mrb[55].mxu1 }
 0x2c7   : > { %1728 = vst [vmem:[%s2913_s6 + $0x2b8] sm:$0xff] %v1608_v25 }
 0x2cb   : > { %v1612_v52 = vpop.f32.mrb[56].mxu1 }
 0x2cc   : > { %1729 = vst [vmem:[%s2913_s6 + $0x2c0] sm:$0xff] %v1612_v52  ;;  %v1614_v37 = vpop.f32.mrb[57].mxu1 }
 0x2cd   : > { %1730 = vst [vmem:[%s2913_s6 + $0x2c8] sm:$0xff] %v1614_v37  ;;  %v1616_v26 = vpop.f32.mrb[58].mxu1 }
 0x2ce   : > { %1731 = vst [vmem:[%s2913_s6 + $0x2d0] sm:$0xff] %v1616_v26  ;;  %v1618_v58 = vpop.f32.mrb[59].mxu1 }
 0x2cf   : > { %1732 = vst [vmem:[%s2913_s6 + $0x2d8] sm:$0xff] %v1618_v58 }
 0x2d3   : > { %v1622_v27 = vpop.f32.mrb[60].mxu1 }
 0x2d4   : > { %1733 = vst [vmem:[%s2913_s6 + $0x2e0] sm:$0xff] %v1622_v27  ;;  %v1624_v49 = vpop.f32.mrb[61].mxu1 }
 0x2d5   : > { %1734 = vst [vmem:[%s2913_s6 + $0x2e8] sm:$0xff] %v1624_v49  ;;  %v1626_v33 = vpop.f32.mrb[62].mxu1 }
 0x2d6   : > { %1735 = vst [vmem:[%s2913_s6 + $0x2f0] sm:$0xff] %v1626_v33  ;;  %v1628_v22 = vpop.f32.mrb[63].mxu1 }
 0x2d7   : > { %1736 = vst [vmem:[%s2913_s6 + $0x2f8] sm:$0xff] %v1628_v22 }
 0x2db   : > { %v1632_v35 = vpop.f32.mrb[64].mxu1 }
 0x2dc   : > { %1737 = vst [vmem:[%s2913_s6 + $0x300] sm:$0xff] %v1632_v35  ;;  %v1634_v40 = vpop.f32.mrb[65].mxu1 }
 0x2dd   : > { %1738 = vst [vmem:[%s2913_s6 + $0x308] sm:$0xff] %v1634_v40  ;;  %v1636_v62 = vpop.f32.mrb[66].mxu1 }
 0x2de   : > { %1739 = vst [vmem:[%s2913_s6 + $0x310] sm:$0xff] %v1636_v62  ;;  %v1638_v10 = vpop.f32.mrb[67].mxu1 }
 0x2df   : > { %1740 = vst [vmem:[%s2913_s6 + $0x318] sm:$0xff] %v1638_v10 }
 0x2e0 PF: > { %s14_s15 = sadd.s32 1, %s2353_s15  }
 0x2e1   : > { %p11_p4 = scmp.ge.s32.totalorder %s14_s15, 4  }
 0x2e3   :  { %13 = sbr.rel (!%p11_p4) target bundleno = 1 (0x1), region = 66 }

</bundles_post_ra>
